<compile_context>
chip_gen: v5e
topology: v5e:2x2
jax: 0.10.0
libtpu: 0.0.40
codegen_flags: <defaults>
</compile_context>

<pallas_src>
import jax
import jax.numpy as jnp
from jax.experimental import pallas as pl
from jax.experimental.pallas import tpu as pltpu

f32 = jnp.float32
bf16 = jnp.bfloat16


def _leaky_relu(x, slope=0.1):
    return jnp.where(x >= 0, x, slope * x)


def _round_up(x, m):
    return (x + m - 1) // m * m


def _tpu_tile_config():
    """Returns (t_hw, vmem_limit_bytes) tuned per TPU generation."""
    kind = ""
    try:
        kind = jax.devices()[0].device_kind.lower()
    except Exception:
        pass
    if any(s in kind for s in ("v2", "v3", "v4", "v5")):
        return 128, 64 * 1024 * 1024      # 128-wide MXU: 128 tiles already saturate
    if "v6" in kind:
        return 256, 64 * 1024 * 1024      # 256-wide MXU
    return 256, 48 * 1024 * 1024          # v7x / unknown: 256 tiles, 64 MiB total VMEM


def fusion_aware_interp(uv, feat_2d, feat_3d, params):
    """uv: [bs, 2, N] (pixel coords, x then y); feat_2d: [bs, C2d, h, w];
    feat_3d: [bs, C3d, N]; params = (w1, b1, w2, b2, w3, b3) of the 1x1 convs."""
    bs, c2d, h, w = feat_2d.shape
    c3d = feat_3d.shape[1]
    n = uv.shape[2]
    hw = h * w

    # ---- tiling / padding constants ----
    t_hw, vmem_limit = _tpu_tile_config()
    hw_pad = _round_up(hw, t_hw)
    n_pad = _round_up(n, 256)
    n_chunk = 512 if n_pad % 512 == 0 else 256
    n_n_blk = n_pad // n_chunk
    n_hw_blk = hw_pad // t_hw
    c2_pad = _round_up(c2d, 8)
    c3_pad = _round_up(c3d, 8)
    cb = c3_pad + c2_pad          # first coordinate row inside the stacked features
    cf = cb + 8                   # stacked point-feature rows (coords padded to 8)
    inv_c2d = 1.0 / float(c2d)

    # ---- host-side layout prep ----
    # pixel-coordinate tables shared across the batch (padded pixels = -1e6 sentinel)
    gxg, gyg = jnp.meshgrid(jnp.arange(w, dtype=f32), jnp.arange(h, dtype=f32))
    gx_p = jnp.pad(gxg.reshape(-1), (0, hw_pad - hw), constant_values=-1e6)
    gy_p = jnp.pad(gyg.reshape(-1), (0, hw_pad - hw), constant_values=-1e6)
    grid_rows = jnp.stack([gx_p, gy_p], axis=0)            # [2, hw_pad]  (lane-dense)
    grid_cols = jnp.stack([gx_p, gy_p], axis=1)            # [hw_pad, 2]  (column form)

    # per-point coords, lane-dense [bs, 2, n_pad]; pad points are far-away sentinels
    uvp = jnp.pad(uv.astype(f32), ((0, 0), (0, 0), (0, n_pad - n)),
                  constant_values=1e6)

    # 2D features: bf16 copy for the MXU grid-sample, f32 copy for the correlation
    feat2d_flat = jnp.pad(feat_2d.astype(f32).reshape(bs, c2d, hw),
                          ((0, 0), (0, c2_pad - c2d), (0, hw_pad - hw)))
    feat2d_bf16 = feat2d_flat.astype(bf16)

    feat3d_p = jnp.pad(feat_3d.astype(f32),
                       ((0, 0), (0, c3_pad - c3d), (0, n_pad - n)))

    # conv weights: split the first conv column-wise (offset / corr / feat3d), pre-cast
    # the MXU operands to bf16, keep VPU-path weights and biases in f32.
    w1, b1, w2, b2, w3, b3 = params
    pc3 = c3_pad - c3d
    w1 = w1.astype(f32)
    w1a = jnp.pad(w1[:, 0:2], ((0, pc3), (0, 0)))                     # offset cols
    w1b = jnp.pad(w1[:, 2:3], ((0, pc3), (0, 0)))                     # correlation col
    w1c = jnp.pad(w1[:, 3:], ((0, pc3), (0, pc3))).astype(bf16)       # feat3d cols
    w2p = jnp.pad(w2.astype(f32), ((0, pc3), (0, pc3))).astype(bf16)
    w3p = jnp.pad(w3.astype(f32), ((0, pc3), (0, pc3))).astype(bf16)
    b1p = jnp.pad(b1.astype(f32).reshape(-1, 1), ((0, pc3), (0, 0)))
    b2p = jnp.pad(b2.astype(f32).reshape(-1, 1), ((0, pc3), (0, 0)))
    b3p = jnp.pad(b3.astype(f32).reshape(-1, 1), ((0, pc3), (0, 0)))

    # =========================================================================
    # Kernel A: bilinear grid-sample of feat_2d at the N points.
    #   sampled2d[b, c, p] = sum_j feat2d[b, c, j] * w_tent[j, p]
    # Grid: (batch, HW-tile).  feat_2d is streamed once per (b, t); the N axis is
    # an in-kernel chunk loop accumulating into a full-N f32 scratch; the bf16
    # output is written at the last HW tile.
    # =========================================================================
    def sample_kernel(gcol_ref, uv_ref, f2d_ref, out_ref, acc_ref):
        t = pl.program_id(1)

        @pl.when(t == 0)
        def _init():
            acc_ref[...] = jnp.zeros_like(acc_ref)

        gx_c = gcol_ref[:, 0:1]                              # [T, 1]
        gy_c = gcol_ref[:, 1:2]
        f2 = f2d_ref[0]                                      # [C2, T] bf16

        def body(c, carry):
            base = pl.multiple_of(c * n_chunk, n_chunk)
            px = uv_ref[0, 0:1, pl.ds(base, n_chunk)]        # [1, NC]
            py = uv_ref[0, 1:2, pl.ds(base, n_chunk)]
            # tent-form bilinear weights (== grid_sample align_corners=True, zeros pad);
            # sentinel points / pixels give exactly 0.
            wx = jnp.maximum(0.0, 1.0 - jnp.abs(gx_c - px))  # [T, NC]
            wy = jnp.maximum(0.0, 1.0 - jnp.abs(gy_c - py))
            w_samp = (wx * wy).astype(bf16)
            contrib = jnp.dot(f2, w_samp, preferred_element_type=f32)   # [C2, NC]
            acc_ref[:, pl.ds(base, n_chunk)] = (
                acc_ref[:, pl.ds(base, n_chunk)] + contrib)
            return carry

        jax.lax.fori_loop(0, n_n_blk, body, 0)

        @pl.when(t == pl.num_programs(1) - 1)
        def _done():
            out_ref[0] = acc_ref[...].astype(out_ref.dtype)

    sampled2d = pl.pallas_call(
        sample_kernel,
        out_shape=jax.ShapeDtypeStruct((bs, c2_pad, n_pad), bf16),
        grid_spec=pltpu.PrefetchScalarGridSpec(
            num_scalar_prefetch=0,
            grid=(bs, n_hw_blk),
            in_specs=[
                pl.BlockSpec((t_hw, 2), lambda b, t: (t, 0)),            # grid (cols)
                pl.BlockSpec((1, 2, n_pad), lambda b, t: (b, 0, 0)),     # uv (resident)
                pl.BlockSpec((1, c2_pad, t_hw), lambda b, t: (b, 0, t)), # feat2d bf16
            ],
            out_specs=pl.BlockSpec((1, c2_pad, n_pad), lambda b, t: (b, 0, 0)),
            scratch_shapes=[pltpu.VMEM((c2_pad, n_pad), f32)],
        ),
        compiler_params=pltpu.CompilerParams(
            dimension_semantics=("parallel", "arbitrary"),
            vmem_limit_bytes=vmem_limit),
    )(grid_cols, uvp, feat2d_bf16)

    # ---- stacked bf16 point features for the fused one-hot gather -----------
    # coordinates ride the gather as an exact 3-way bf16 hi/mid/lo split:
    # hi + mid + lo == coordinate to within an f32 ulp, and the one-hot gather of
    # each bf16 part is exact (f32 accumulation), so offsets stay f32-accurate.
    def _split3(v):
        hi = v.astype(bf16)
        r1 = v - hi.astype(f32)
        mid = r1.astype(bf16)
        lo = (r1 - mid.astype(f32)).astype(bf16)
        return hi, mid, lo

    x_hi, x_mid, x_lo = _split3(uvp[:, 0, :])
    y_hi, y_mid, y_lo = _split3(uvp[:, 1, :])
    zrow = jnp.zeros_like(x_hi)
    coord_rows = jnp.stack([x_hi, x_mid, x_lo, y_hi, y_mid, y_lo, zrow, zrow],
                           axis=1)                                       # [bs, 8, n_pad]
    pointfeat = jnp.concatenate(
        [feat3d_p.astype(bf16), sampled2d, coord_rows], axis=1)          # [bs, cf, n_pad]

    # =========================================================================
    # Kernel B: per (batch, HW tile) — chunked 1-NN search, fused one-hot gather,
    # correlation, and the 3x (1x1 conv + LeakyReLU(0.1)) MLP.
    # =========================================================================
    def main_kernel(gcol_ref, grow_ref, uv_ref, pf_ref, f2d_ref,
                    w1a_ref, w1b_ref, w1c_ref, b1_ref,
                    w2_ref, b2_ref, w3_ref, b3_ref, out_ref, acc_ref):
        gx_c = gcol_ref[:, 0:1]                              # [T, 1]
        gy_c = gcol_ref[:, 1:2]
        # chunk-local point iota, built once and reused by both passes
        iota_nc = jax.lax.broadcasted_iota(
            jnp.int32, (t_hw, n_chunk), 1).astype(f32)       # [T, NC]

        # ---- pass 1: 1-NN over all points (chunked, vectorized lane-min) ----
        def nn_body(c, carry):
            best, idx = carry
            base = pl.multiple_of(c * n_chunk, n_chunk)
            basef = (c * n_chunk).astype(f32)
            px = uv_ref[0, 0:1, pl.ds(base, n_chunk)]        # [1, NC]
            py = uv_ref[0, 1:2, pl.ds(base, n_chunk)]
            dx = gx_c - px
            dy = gy_c - py
            dist = dx * dx + dy * dy                         # [T, NC]
            cmin = jnp.min(dist, axis=1, keepdims=True)      # [T, 1]
            # lowest index among ties within the chunk (argmin semantics)
            cidx = jnp.min(jnp.where(dist == cmin, iota_nc, float(n_chunk)),
                           axis=1, keepdims=True)            # [T, 1] (chunk-local)
            better = cmin < best
            return (jnp.where(better, cmin, best),
                    jnp.where(better, cidx + basef, idx))

        best0 = jnp.full((t_hw, 1), jnp.inf, dtype=f32)
        idx0 = jnp.zeros((t_hw, 1), dtype=f32)
        _, nn_idx = jax.lax.fori_loop(0, n_n_blk, nn_body, (best0, idx0))

        # ---- pass 2: fused one-hot gather (feat3d + sampled2d + coord parts) ----
        acc_ref[...] = jnp.zeros_like(acc_ref)

        def gather_body(c, carry):
            base = pl.multiple_of(c * n_chunk, n_chunk)
            basef = (c * n_chunk).astype(f32)
            hit = iota_nc == (nn_idx - basef)                # [T, NC]
            onehot = hit.astype(f32).astype(bf16)
            pfc = pf_ref[0, :, pl.ds(base, n_chunk)]         # [CF, NC] bf16
            acc_ref[...] = acc_ref[...] + jax.lax.dot_general(
                pfc, onehot, (((1,), (1,)), ((), ())),
                preferred_element_type=f32)                  # [CF, T]
            return carry

        jax.lax.fori_loop(0, n_n_blk, gather_body, 0)

        nn_f3d = acc_ref[0:c3_pad, :]                        # [C3, T] f32 (exact bf16 vals)
        nn_s2d = acc_ref[c3_pad:cb, :]                       # [C2, T]
        nn_ux = (acc_ref[cb + 0:cb + 1, :] + acc_ref[cb + 1:cb + 2, :]
                 + acc_ref[cb + 2:cb + 3, :])                # [1, T] exact coordinate
        nn_uy = (acc_ref[cb + 3:cb + 4, :] + acc_ref[cb + 4:cb + 5, :]
                 + acc_ref[cb + 5:cb + 6, :])

        # ---- correlation: mean over the real 2D channels (pad channels are 0) ----
        f2d = f2d_ref[0]                                     # [C2, T] f32
        nn_corr = jnp.sum(nn_s2d * f2d, axis=0, keepdims=True) * inv_c2d

        # ---- offsets and 3x (1x1 conv + LeakyReLU(0.1)); no channel concat ----
        gx_r = grow_ref[0:1, :]                              # [1, T]
        gy_r = grow_ref[1:2, :]
        off_x = nn_ux - gx_r
        off_y = nn_uy - gy_r

        w1a = w1a_ref[...]                                   # [C3, 2] f32
        h1 = (jnp.dot(w1c_ref[...], nn_f3d.astype(bf16), preferred_element_type=f32)
              + w1a[:, 0:1] * off_x + w1a[:, 1:2] * off_y
              + w1b_ref[...] * nn_corr
              + b1_ref[...])
        h1 = _leaky_relu(h1)
        h2 = _leaky_relu(jnp.dot(w2_ref[...], h1.astype(bf16),
                                 preferred_element_type=f32) + b2_ref[...])
        h3 = _leaky_relu(jnp.dot(w3_ref[...], h2.astype(bf16),
                                 preferred_element_type=f32) + b3_ref[...])
        out_ref[0] = h3

    out = pl.pallas_call(
        main_kernel,
        out_shape=jax.ShapeDtypeStruct((bs, c3_pad, hw_pad), f32),
        grid_spec=pltpu.PrefetchScalarGridSpec(
            num_scalar_prefetch=0,
            grid=(bs, n_hw_blk),
            in_specs=[
                pl.BlockSpec((t_hw, 2), lambda b, t: (t, 0)),             # grid cols
                pl.BlockSpec((2, t_hw), lambda b, t: (0, t)),             # grid rows
                pl.BlockSpec((1, 2, n_pad), lambda b, t: (b, 0, 0)),      # uv (resident)
                pl.BlockSpec((1, cf, n_pad), lambda b, t: (b, 0, 0)),     # pointfeat bf16
                pl.BlockSpec((1, c2_pad, t_hw), lambda b, t: (b, 0, t)),  # feat2d f32
                pl.BlockSpec((c3_pad, 2), lambda b, t: (0, 0)),           # w1a
                pl.BlockSpec((c3_pad, 1), lambda b, t: (0, 0)),           # w1b
                pl.BlockSpec((c3_pad, c3_pad), lambda b, t: (0, 0)),      # w1c bf16
                pl.BlockSpec((c3_pad, 1), lambda b, t: (0, 0)),           # b1
                pl.BlockSpec((c3_pad, c3_pad), lambda b, t: (0, 0)),      # w2 bf16
                pl.BlockSpec((c3_pad, 1), lambda b, t: (0, 0)),           # b2
                pl.BlockSpec((c3_pad, c3_pad), lambda b, t: (0, 0)),      # w3 bf16
                pl.BlockSpec((c3_pad, 1), lambda b, t: (0, 0)),           # b3
            ],
            out_specs=pl.BlockSpec((1, c3_pad, t_hw), lambda b, t: (b, 0, t)),
            scratch_shapes=[pltpu.VMEM((cf, t_hw), f32)],
        ),
        compiler_params=pltpu.CompilerParams(
            dimension_semantics=("parallel", "parallel"),
            vmem_limit_bytes=vmem_limit),
    )(grid_cols, grid_rows, uvp, pointfeat, feat2d_flat,
      w1a, w1b, w1c, b1p, w2p, b2p, w3p, b3p)

    return out[:, :c3d, :hw].reshape(bs, c3d, h, w)


if __name__ == "__main__":
    key = jax.random.PRNGKey(0)
    # shapes chosen to exercise multiple HW tiles and multiple point chunks
    bs, c2d, c3d, hh, ww, n = 2, 4, 8, 32, 32, 600
    ks = jax.random.split(key, 9)

    uv_x = jax.random.uniform(ks[0], (bs, 1, n), minval=0.0, maxval=ww - 1.0)
    uv_y = jax.random.uniform(ks[1], (bs, 1, n), minval=0.0, maxval=hh - 1.0)
    uv = jnp.concatenate([uv_x, uv_y], axis=1).astype(jnp.float32)   # [bs, 2, n]
    feat_2d = jax.random.normal(ks[2], (bs, c2d, hh, ww), dtype=jnp.float32)
    feat_3d = jax.random.normal(ks[3], (bs, c3d, n), dtype=jnp.float32)

    # deterministic synthetic parameters for the three 1x1 convs
    cin = c3d + 3
    w1 = jax.random.normal(ks[4], (c3d, cin), dtype=jnp.float32) * 0.1
    b1 = jax.random.normal(ks[5], (c3d,), dtype=jnp.float32) * 0.01
    w2 = jax.random.normal(ks[6], (c3d, c3d), dtype=jnp.float32) * 0.1
    b2 = jax.random.normal(ks[7], (c3d,), dtype=jnp.float32) * 0.01
    w3 = jax.random.normal(ks[8], (c3d, c3d), dtype=jnp.float32) * 0.1
    b3 = jnp.zeros((c3d,), dtype=jnp.float32)

    out = fusion_aware_interp(uv, feat_2d, feat_3d, (w1, b1, w2, b2, w3, b3))
    out = jax.block_until_ready(out)
    assert out.shape == (bs, c3d, hh, ww) and out.dtype == jnp.float32
    assert bool(jnp.all(jnp.isfinite(out)))
    print("KERNEL_OK")
</pallas_src>

<mosaic_0001>
module attributes {stable_mosaic.version = 11 : i64} {
  func.func @sample_kernel(%arg0: i32, %arg1: i32, %arg2: memref<256x2xf32, #tpu.memory_space<vmem>>, %arg3: memref<1x2x768xf32, #tpu.memory_space<vmem>>, %arg4: memref<1x8x256xbf16, #tpu.memory_space<vmem>>, %arg5: memref<1x8x768xbf16, #tpu.memory_space<vmem>>, %arg6: memref<8x768xf32, #tpu.memory_space<vmem>>) attributes {dimension_semantics = [#tpu.dimension_semantics<parallel>, #tpu.dimension_semantics<arbitrary>], iteration_bounds = array<i64: 2, 4>, scalar_prefetch = 0 : i64, scratch_operands = 1 : i64, tpu.core_type = #tpu.core_type<tc>, window_params = [{transform_indices = @transform_0, window_bounds = array<i64: 256, 2>}, {transform_indices = @transform_1, window_bounds = array<i64: 1, 2, 768>}, {transform_indices = @transform_2, window_bounds = array<i64: 1, 8, 256>}, {transform_indices = @transform_3, window_bounds = array<i64: 1, 8, 768>}]} {
    %c0_i32 = arith.constant 0 : i32
    %0 = arith.cmpi eq, %arg1, %c0_i32 : i32
    %1 = arith.extui %0 : i1 to i32
    %c0_i32_0 = arith.constant 0 : i32
    %2 = arith.cmpi ne, %1, %c0_i32_0 : i32
    scf.if %2 {
      %cst = arith.constant 0.000000e+00 : f32
      %11 = vector.broadcast %cst : f32 to vector<8x768xf32>
      %c0_10 = arith.constant 0 : index
      %c0_11 = arith.constant 0 : index
      %12 = vector.load %arg6[%c0_10, %c0_11] : memref<8x768xf32, #tpu.memory_space<vmem>>, vector<8x768xf32>
      tpu.vector_store %arg6[%c0_10, %c0_11], %11 {strides = array<i32>} : memref<8x768xf32, #tpu.memory_space<vmem>>, vector<8x768xf32>,
    } else {
    }
    %c0 = arith.constant 0 : index
    %c0_1 = arith.constant 0 : index
    %3 = vector.load %arg2[%c0, %c0_1] : memref<256x2xf32, #tpu.memory_space<vmem>>, vector<256x1xf32>
    %c0_2 = arith.constant 0 : index
    %c1 = arith.constant 1 : index
    %4 = vector.load %arg2[%c0_2, %c1] : memref<256x2xf32, #tpu.memory_space<vmem>>, vector<256x1xf32>
    %c0_3 = arith.constant 0 : index
    %c0_4 = arith.constant 0 : index
    %c0_5 = arith.constant 0 : index
    %5 = vector.load %arg4[%c0_3, %c0_4, %c0_5] : memref<1x8x256xbf16, #tpu.memory_space<vmem>>, vector<1x8x256xbf16>
    %6 = vector.shape_cast %5 : vector<1x8x256xbf16> to vector<8x256xbf16>
    %c0_i32_6 = arith.constant 0 : i32
    %c3_i32 = arith.constant 3 : i32
    %7 = arith.addi %c0_i32_6, %c3_i32 : i32
    %c1_i32 = arith.constant 1 : i32
    scf.for %arg7 = %c0_i32_6 to %7 step %c1_i32  : i32 {
      %c256_i32 = arith.constant 256 : i32
      %11 = arith.muli %arg7, %c256_i32 : i32
      %12 = tpu.assume_multiple %11, 256 : i32
      %c0_10 = arith.constant 0 : index
      %c0_11 = arith.constant 0 : index
      %13 = arith.index_cast %12 : i32 to index
      %14 = vector.load %arg3[%c0_10, %c0_11, %13] : memref<1x2x768xf32, #tpu.memory_space<vmem>>, vector<1x1x256xf32>
      %15 = vector.shape_cast %14 : vector<1x1x256xf32> to vector<1x256xf32>
      %c0_12 = arith.constant 0 : index
      %c1_13 = arith.constant 1 : index
      %16 = arith.index_cast %12 : i32 to index
      %17 = vector.load %arg3[%c0_12, %c1_13, %16] : memref<1x2x768xf32, #tpu.memory_space<vmem>>, vector<1x1x256xf32>
      %18 = vector.shape_cast %17 : vector<1x1x256xf32> to vector<1x256xf32>
      %19 = vector.broadcast %3 : vector<256x1xf32> to vector<256x256xf32>
      %20 = vector.broadcast %15 : vector<1x256xf32> to vector<256x256xf32>
      %21 = arith.subf %19, %20 : vector<256x256xf32>
      %22 = math.absf %21 : vector<256x256xf32>
      %cst = arith.constant 1.000000e+00 : f32
      %23 = vector.broadcast %cst : f32 to vector<256x256xf32>
      %24 = arith.subf %23, %22 : vector<256x256xf32>
      %cst_14 = arith.constant 0.000000e+00 : f32
      %25 = vector.broadcast %cst_14 : f32 to vector<256x256xf32>
      %26 = arith.maximumf %25, %24 : vector<256x256xf32>
      %27 = vector.broadcast %4 : vector<256x1xf32> to vector<256x256xf32>
      %28 = vector.broadcast %18 : vector<1x256xf32> to vector<256x256xf32>
      %29 = arith.subf %27, %28 : vector<256x256xf32>
      %30 = math.absf %29 : vector<256x256xf32>
      %cst_15 = arith.constant 1.000000e+00 : f32
      %31 = vector.broadcast %cst_15 : f32 to vector<256x256xf32>
      %32 = arith.subf %31, %30 : vector<256x256xf32>
      %cst_16 = arith.constant 0.000000e+00 : f32
      %33 = vector.broadcast %cst_16 : f32 to vector<256x256xf32>
      %34 = arith.maximumf %33, %32 : vector<256x256xf32>
      %35 = arith.mulf %26, %34 : vector<256x256xf32>
      %36 = arith.truncf %35 : vector<256x256xf32> to vector<256x256xbf16>
      %cst_17 = arith.constant dense<0.000000e+00> : vector<8x256xf32>
      %37 = tpu.matmul %6, %36, %cst_17 {dimension_numbers = #tpu.dot_dimension_numbers<[1], [0], [0], [1], [0, 0, 1, 1], [], []>} : vector<8x256xbf16>, vector<256x256xbf16>, vector<8x256xf32> -> vector<8x256xf32>
      %c0_18 = arith.constant 0 : index
      %38 = arith.index_cast %12 : i32 to index
      %39 = vector.load %arg6[%c0_18, %38] : memref<8x768xf32, #tpu.memory_space<vmem>>, vector<8x256xf32>
      %40 = arith.addf %39, %37 : vector<8x256xf32>
      %c0_19 = arith.constant 0 : index
      %41 = arith.index_cast %12 : i32 to index
      %42 = vector.load %arg6[%c0_19, %41] : memref<8x768xf32, #tpu.memory_space<vmem>>, vector<8x256xf32>
      tpu.vector_store %arg6[%c0_19, %41], %40 {strides = array<i32>} : memref<8x768xf32, #tpu.memory_space<vmem>>, vector<8x256xf32>,
    }
    %c3_i32_7 = arith.constant 3 : i32
    %c3_i32_8 = arith.constant 3 : i32
    %8 = arith.cmpi eq, %arg1, %c3_i32_8 : i32
    %9 = arith.extui %8 : i1 to i32
    %c0_i32_9 = arith.constant 0 : i32
    %10 = arith.cmpi ne, %9, %c0_i32_9 : i32
    scf.if %10 {
      %c0_10 = arith.constant 0 : index
      %c0_11 = arith.constant 0 : index
      %11 = vector.load %arg6[%c0_10, %c0_11] : memref<8x768xf32, #tpu.memory_space<vmem>>, vector<8x768xf32>
      %12 = arith.truncf %11 : vector<8x768xf32> to vector<8x768xbf16>
      %c0_12 = arith.constant 0 : index
      %c0_13 = arith.constant 0 : index
      %c0_14 = arith.constant 0 : index
      %13 = vector.load %arg5[%c0_12, %c0_13, %c0_14] : memref<1x8x768xbf16, #tpu.memory_space<vmem>>, vector<1x8x768xbf16>
      %14 = vector.shape_cast %13 : vector<1x8x768xbf16> to vector<8x768xbf16>
      %15 = vector.shape_cast %12 : vector<8x768xbf16> to vector<1x8x768xbf16>
      tpu.vector_store %arg5[%c0_12, %c0_13, %c0_14], %15 {strides = array<i32>} : memref<1x8x768xbf16, #tpu.memory_space<vmem>>, vector<1x8x768xbf16>,
    } else {
    }
    return
  }
  func.func @transform_0(%arg0: i32, %arg1: i32) -> (i32, i32) {
    %c0_i32 = arith.constant 0 : i32
    %c0_i32_0 = arith.constant 0 : i32
    return %arg1, %c0_i32 : i32, i32
  }
  func.func @transform_1(%arg0: i32, %arg1: i32) -> (i32, i32, i32) {
    %c0_i32 = arith.constant 0 : i32
    %c0_i32_0 = arith.constant 0 : i32
    %c0_i32_1 = arith.constant 0 : i32
    return %arg0, %c0_i32, %c0_i32_0 : i32, i32, i32
  }
  func.func @transform_2(%arg0: i32, %arg1: i32) -> (i32, i32, i32) {
    %c0_i32 = arith.constant 0 : i32
    %c0_i32_0 = arith.constant 0 : i32
    return %arg0, %c0_i32, %arg1 : i32, i32, i32
  }
  func.func @transform_3(%arg0: i32, %arg1: i32) -> (i32, i32, i32) {
    %c0_i32 = arith.constant 0 : i32
    %c0_i32_0 = arith.constant 0 : i32
    %c0_i32_1 = arith.constant 0 : i32
    return %arg0, %c0_i32, %c0_i32_0 : i32, i32, i32
  }
}

</mosaic_0001>

<bundles_post_ra>
// kernel: tpu_custom_call.1
= control target key start
LH: loop header
LB: loop body
LE: loop exit
PB: predicated region body
PF: predicated region fallthrough
CT: control target
= control target key end

     0   :  { %8 = vsyncpa [#allocation4], 0  ;;  %s2431_s0 = inlined_call_operand.vmem [shape: f32[1024,2], index: 0, kind: input, shape index: {}]   ;;  %s2432_s1 = inlined_call_operand.vmem [shape: f32[2,2,768], index: 1, kind: input, shape index: {}]   ;;  %s2433_s2 = inlined_call_operand.vmem [shape: bf16[2,8,1024], index: 2, kind: input, shape index: {}]   ;;  %s2434_s3 = inlined_call_operand.hbm [shape: bf16[2,8,768], index: 3, kind: output, shape index: {}]  }
   0x1   :  { %10 = vsyncpa [#allocation4 + $0x1], 0  ;;  %s1651_s12 = smov 0   ;;  %s1653_s13 = smov 0  }
   0x2   :  { %s1655_s14 = smov 0   ;;  %s1657_s15 = smov 0  }
   0x3   :  { %s1659_s16 = smov 0   ;;  %s1661_s17 = smov 0  }
   0x4   :  { %s1663_s18 = smov 0   ;;  %s1665_s19 = smov 0  }
   0x5 LB: > { %2482 = sst [smem:[#allocation6_spill]] %s1614_s17  ;;  %s1411_s20 = sadd.s32 4294967295, %s1622_s19   ;;  %s1622_s19 = sphi %s1665_s19, %s16_s19   ;;  %s1618_s18 = sphi %s1663_s18, %s2629_s18   ;;  %s1614_s17 = sphi %s1661_s17, %s2628_s17   ;;  %s1610_s16 = sphi %s1659_s16, %s2627_s16   ;;  %s1606_s15 = sphi %s1657_s15, %s2626_s15   ;;  %s1602_s14 = sphi %s1655_s14, %s2632_s14   ;;  %s1598_s13 = sphi %s1653_s13, %s2631_s13   ;;  %s1594_s12 = sphi %s1651_s12, %s2630_s12  }
   0x6   : > { %2483 = sst [smem:[#allocation7_spill]] %s1618_s18  ;;  %s1412_s21 = sadd.s32 4294967294, %s1622_s19  }
   0x7   : > { %s25_s22 = sadd.s32 1, %s1614_s17  ;;  %s28_s23 = sadd.s32 1, %s1618_s18 }
   0x8   : > { %p26_p0 = scmp.ge.s32.totalorder %s25_s22, 4  ;;  %p125_p1 = scmp.ne.s32.totalorder %s1602_s14, %s1598_s13 }
   0x9   : > { %p126_p2 = scmp.eq.s32.totalorder %s1411_s20, 7  ;;  %p131_p4 = scmp.ne.s32.totalorder %s1598_s13, %s1594_s12 }
   0xa   : > { %s2634_s22 = smov (%p26_p0, %s25_s22), 0  ;;  %s2636_s23 = smov (!%p26_p0, %s28_s23), %s1618_s18 }
   0xb   : > { %2484 = sst [smem:[#allocation8_spill]] %s2634_s22  ;;  %p1700_p3 = por %p126_p2, %p125_p1 }
   0xc   : > { %p30_p5 = scmp.ge.s32.totalorder %s2636_s23, 2  ;;  %p132_p6 = scmp.eq.s32.totalorder %s1412_s21, 7 }
   0xd   : > { %p1415_p7 = scmp.ge.s32.totalorder %s1622_s19, 1  ;;  %p180_p8 = scmp.lt.s32.totalorder %s1622_s19, 9 }
   0xe   : > { %s2638_s23 = smov (%p30_p5, %s2636_s23), 0  ;;  %p1710_p9 = por %p132_p6, %p131_p4 }
   0xf   : > { %2486 = sst [smem:[#allocation9_spill]] %s2638_s23  ;;  %p181_p10 = pnand %p1415_p7, %p180_p8 }
  0x10   : > { %s112_s26 = ssub.s32 %s1618_s18, %s2638_s23  ;;  %s115_s27 = sadd.s32 1, %s1602_s14 }
  0x11   : > { %p113_p11 = scmp.eq.s32.totalorder %s112_s26, 0  ;;  %184 = sbr.rel (%p181_p10) target bundleno = 555 (0x22b), region = 32 }
  0x13   : > { %s1718_s28 = scalar_select %p113_p11, %s1602_s14, %s115_s27  }
  0x16   : > { %s2435_s29 = sand.u32 1, %s1598_s13   ;;  %s1416_s30 = sshll.u32 %s1606_s15, 5 }
  0x17   : > { %s1431_s4 = smul.u32 24, %s2435_s29  ;;  %p219_p12 = scmp.lt.s32.totalorder %s1416_s30, 127 }
  0x18   : > { %p224_p13 = scmp.lt.s32.totalorder %s1610_s16, 1  ;;  %s1419_s5 = sshll.u32 %s1606_s15, 1 }
  0x19   : > { %p232_p0 = scmp.lt.s32.totalorder %s1419_s5, 7  ;;  %s2640_s30 = smov (!%p219_p12, %s1416_s30), 127 }
  0x1a   : > { %s225_s6 = scalar_select %p224_p13, %s1610_s16, 1 }
  0x1b   : > { %s1417_s7 = sshll.u32 %s2640_s30, 3  ;;  %s2642_s5 = smov (!%p232_p0, %s1419_s5), 7 }
  0x1c   : > { %s1730_s10 = scalar_lea.vmem %s2431_s0, %s1417_s7  ;;  %s1432_s11 = smul.u32 12, %s225_s6 }
  0x1d   : > { %s1420_s27 = sshll.u32 %s225_s6, 3  ;;  %s1742_s30 = scalar_lea.vmem [#allocation3], %s1431_s4 }
  0x1e   : > { %s1735_s26 = scalar_lea.vmem %s2432_s1, %s1432_s11  ;;  %s235_s29 = sadd.s32 %s1420_s27, %s2642_s5 }
  0x1f   : > { %s1421_s23 = sshll.u32 %s235_s29, 2  ;;  %p1422_p1 = scmp.ne.s32.totalorder %s1606_s15, 0 }
  0x20   : > { %s1740_s17 = scalar_lea.vmem %s2433_s2, %s1421_s23 }
  0x21   : > { %242 = sbr.rel (%p1422_p1) target bundleno = 45 (0x2d), region = 36 }
  0x26   : > { %v1628_v0 = vmov 0.0  }
  0x27   : > { %243 = vst [vmem:[#allocation2] sm:$0xff] %v1628_v0 }
  0x28   : > { %244 = vst [vmem:[#allocation2 + $0x8] sm:$0xff] %v1628_v0 }
  0x29   : > { %245 = vst [vmem:[#allocation2 + $0x10] sm:$0xff] %v1628_v0 }
  0x2a   : > { %246 = vst [vmem:[#allocation2 + $0x18] sm:$0xff] %v1628_v0 }
  0x2b   : > { %247 = vst [vmem:[#allocation2 + $0x20] sm:$0xff] %v1628_v0 }
  0x2c   : > { %248 = vst [vmem:[#allocation2 + $0x28] sm:$0xff] %v1628_v0 }
  0x2d PF: > { %v1746_v1 = vld [vmem:[%s1730_s10] sm:$0xff]  ;;  %v1749_v2 = vld [vmem:[%s1730_s10 + $0x8] sm:$0xff]  ;;  %v1752_v3 = vld [vmem:[%s1730_s10 + $0x10] sm:$0xff]  ;;  %s1844_s18 = smov 0  }
  0x2e   : > { %2488 = vst [vmem:[#allocation10_spill] sm:$0xff] %v1746_v1  ;;  %v1755_v4 = vld [vmem:[%s1730_s10 + $0x18] sm:$0xff]  ;;  %v1758_v5 = vld [vmem:[%s1730_s10 + $0x20] sm:$0xff]  ;;  %v1761_v6 = vld [vmem:[%s1730_s10 + $0x28] sm:$0xff] }
  0x2f   : > { %2489 = vst [vmem:[#allocation11_spill] sm:$0xff] %v1749_v2  ;;  %v1764_v7 = vld [vmem:[%s1730_s10 + $0x30] sm:$0xff]  ;;  %v1767_v8 = vld [vmem:[%s1730_s10 + $0x38] sm:$0xff]  ;;  %v1770_v9 = vld [vmem:[%s1730_s10 + $0x40] sm:$0xff] }
  0x30   : > { %2490 = vst [vmem:[#allocation12_spill] sm:$0xff] %v1752_v3  ;;  %v1773_v10 = vld [vmem:[%s1730_s10 + $0x48] sm:$0xff]  ;;  %v1776_v11 = vld [vmem:[%s1730_s10 + $0x50] sm:$0xff]  ;;  %v1779_v12 = vld [vmem:[%s1730_s10 + $0x58] sm:$0xff] }
  0x31   : > { %2491 = vst [vmem:[#allocation13_spill] sm:$0xff] %v1755_v4  ;;  %v1782_v13 = vld [vmem:[%s1730_s10 + $0x60] sm:$0xff]  ;;  %v1785_v14 = vld [vmem:[%s1730_s10 + $0x68] sm:$0xff]  ;;  %v1788_v15 = vld [vmem:[%s1730_s10 + $0x70] sm:$0xff] }
  0x32   : > { %2492 = vst [vmem:[#allocation14_spill] sm:$0xff] %v1758_v5  ;;  %v1791_v16 = vld [vmem:[%s1730_s10 + $0x78] sm:$0xff]  ;;  %v1794_v17 = vld [vmem:[%s1730_s10 + $0x80] sm:$0xff]  ;;  %v1797_v18 = vld [vmem:[%s1730_s10 + $0x88] sm:$0xff] }
  0x33   : > { %2493 = vst [vmem:[#allocation15_spill] sm:$0xff] %v1761_v6  ;;  %v1800_v19 = vld [vmem:[%s1730_s10 + $0x90] sm:$0xff]  ;;  %v1803_v20 = vld [vmem:[%s1730_s10 + $0x98] sm:$0xff]  ;;  %v1806_v21 = vld [vmem:[%s1730_s10 + $0xa0] sm:$0xff] }
  0x34   : > { %2494 = vst [vmem:[#allocation16_spill] sm:$0xff] %v1764_v7  ;;  %v1809_v22 = vld [vmem:[%s1730_s10 + $0xa8] sm:$0xff]  ;;  %v1812_v23 = vld [vmem:[%s1730_s10 + $0xb0] sm:$0xff]  ;;  %v1815_v24 = vld [vmem:[%s1730_s10 + $0xb8] sm:$0xff] }
  0x35   : > { %2495 = vst [vmem:[#allocation17_spill] sm:$0xff] %v1767_v8  ;;  %v1818_v25 = vld [vmem:[%s1730_s10 + $0xc0] sm:$0xff]  ;;  %v1821_v26 = vld [vmem:[%s1730_s10 + $0xc8] sm:$0xff]  ;;  %v1824_v27 = vld [vmem:[%s1730_s10 + $0xd0] sm:$0xff] }
  0x36   : > { %2496 = vst [vmem:[#allocation18_spill] sm:$0xff] %v1770_v9  ;;  %v1827_v28 = vld [vmem:[%s1730_s10 + $0xd8] sm:$0xff]  ;;  %v1830_v29 = vld [vmem:[%s1730_s10 + $0xe0] sm:$0xff]  ;;  %v1833_v30 = vld [vmem:[%s1730_s10 + $0xe8] sm:$0xff] }
  0x37   : > { %2497 = vst [vmem:[#allocation19_spill] sm:$0xff] %v1773_v10  ;;  %v1836_v31 = vld [vmem:[%s1730_s10 + $0xf0] sm:$0xff]  ;;  %v1839_v32 = vld [vmem:[%s1730_s10 + $0xf8] sm:$0xff]  ;;  %v1842_v33 = vld [vmem:[%s1740_s17] sm:$0xff] }
  0x38   : > { %2498 = vst [vmem:[#allocation20_spill] sm:$0xff] %v1776_v11 }
  0x39   : > { %2499 = vst [vmem:[#allocation21_spill] sm:$0xff] %v1779_v12 }
  0x3a   : > { %2500 = vst [vmem:[#allocation22_spill] sm:$0xff] %v1782_v13 }
  0x3b   : > { %2501 = vst [vmem:[#allocation23_spill] sm:$0xff] %v1785_v14 }
  0x3c   : > { %2502 = vst [vmem:[#allocation24_spill] sm:$0xff] %v1788_v15 }
  0x3d   : > { %2503 = vst [vmem:[#allocation25_spill] sm:$0xff] %v1791_v16 }
  0x3e   : > { %2504 = vst [vmem:[#allocation26_spill] sm:$0xff] %v1794_v17 }
  0x3f   : > { %2505 = vst [vmem:[#allocation27_spill] sm:$0xff] %v1797_v18 }
  0x40   : > { %2506 = vst [vmem:[#allocation28_spill] sm:$0xff] %v1800_v19 }
  0x41   : > { %2507 = vst [vmem:[#allocation29_spill] sm:$0xff] %v1803_v20 }
  0x42   : > { %2508 = vst [vmem:[#allocation30_spill] sm:$0xff] %v1806_v21 }
  0x43   : > { %2509 = vst [vmem:[#allocation31_spill] sm:$0xff] %v1809_v22 }
  0x44   : > { %2510 = vst [vmem:[#allocation32_spill] sm:$0xff] %v1812_v23 }
  0x45   : > { %2511 = vst [vmem:[#allocation33_spill] sm:$0xff] %v1815_v24 }
  0x46   : > { %2512 = vst [vmem:[#allocation34_spill] sm:$0xff] %v1818_v25 }
  0x47   : > { %2513 = vst [vmem:[#allocation35_spill] sm:$0xff] %v1821_v26 }
  0x48   : > { %2514 = vst [vmem:[#allocation36_spill] sm:$0xff] %v1824_v27 }
  0x49   : > { %2515 = vst [vmem:[#allocation37_spill] sm:$0xff] %v1827_v28 }
  0x4a   : > { %2516 = vst [vmem:[#allocation38_spill] sm:$0xff] %v1830_v29 }
  0x4b   : > { %2517 = vst [vmem:[#allocation39_spill] sm:$0xff] %v1833_v30 }
  0x4c   : > { %2518 = vst [vmem:[#allocation40_spill] sm:$0xff] %v1836_v31 }
  0x4d   : > { %2519 = vst [vmem:[#allocation41_spill] sm:$0xff] %v1839_v32 }
  0x4e   : > { %2520 = vst [vmem:[#allocation42_spill] sm:$0xff] %v1842_v33 }
  0x4f LB: >> { %v2521_v17 = vld [vmem:[#allocation26_spill] sm:$0xff]  ;;  %v2523_v2 = vld [vmem:[#allocation11_spill] sm:$0xff]  ;;  %v2528_v20 = vld [vmem:[#allocation29_spill] sm:$0xff]  ;;  %v1629_v34 = vmov 0   ;;  %v1630_v35 = vmov 1   ;;  %s1423_s17 = sshll.u32 %s1626_s18, 8  ;;  %s1626_s18 = sphi %s1844_s18, %s287_s18  }
  0x50   : >> { %v2527_v28 = vld [vmem:[#allocation37_spill] sm:$0xff]  ;;  %v2529_v27 = vld [vmem:[#allocation36_spill] sm:$0xff]  ;;  %v2530_v26 = vld [vmem:[#allocation35_spill] sm:$0xff]  ;;  %1518 = vset.pattern.permute.xlu2 %v1629_v34  ;;  %1517 = vset.pattern.permute.xlu1 %v1629_v34  ;;  %s1896_s22 = sshra.s32 %s1423_s17, 7  ;;  %s287_s18 = sadd.s32 1, %s1626_s18  }
  0x51   : >> { %v2526_v29 = vld [vmem:[#allocation38_spill] sm:$0xff]  ;;  %v2532_v24 = vld [vmem:[#allocation33_spill] sm:$0xff]  ;;  %v2533_v19 = vld [vmem:[#allocation28_spill] sm:$0xff]  ;;  %1516 = vset.pattern.permute.xlu0 %v1629_v34  ;;  %s1424_s23 = sshll.u32 %s1896_s22, 1  ;;  %s1426_s4 = sshll.u32 %s1896_s22, 3 }
  0x52   : >> { %v2525_v30 = vld [vmem:[#allocation39_spill] sm:$0xff]  ;;  %v2531_v25 = vld [vmem:[#allocation34_spill] sm:$0xff]  ;;  %v2534_v23 = vld [vmem:[#allocation32_spill] sm:$0xff]  ;;  %s1901_s29 = scalar_lea.vmem %s1735_s26, %s1424_s23  ;;  %s1262_s5 = scalar_lea.vmem [#allocation2], %s1426_s4 }
  0x53   : >> { %v2524_v31 = vld [vmem:[#allocation40_spill] sm:$0xff]  ;;  %v2535_v22 = vld [vmem:[#allocation31_spill] sm:$0xff]  ;;  %v2536_v21 = vld [vmem:[#allocation30_spill] sm:$0xff]  ;;  %p284_p2 = scmp.ge.s32.totalorder %s287_s18, 3  }
  0x54   : >> { %v2522_v32 = vld [vmem:[#allocation41_spill] sm:$0xff]  ;;  %v2537_v18 = vld [vmem:[#allocation27_spill] sm:$0xff]  ;;  %v2538_v3 = vld [vmem:[#allocation12_spill] sm:$0xff]  ;;  %p1427_p4 = scmp.ne.s32.totalorder (%p284_p2), %s1606_s15, 3 }
  0x55   : >> { %v2539_v16 = vld [vmem:[#allocation25_spill] sm:$0xff]  ;;  %v2540_v15 = vld [vmem:[#allocation24_spill] sm:$0xff]  ;;  %v2541_v14 = vld [vmem:[#allocation23_spill] sm:$0xff]  ;;  %308 = vperm.xlu1 %1517, %v2538_v3  }
  0x56   : >> { %v2542_v6 = vld [vmem:[#allocation15_spill] sm:$0xff]  ;;  %v2543_v13 = vld [vmem:[#allocation22_spill] sm:$0xff]  ;;  %v2544_v12 = vld [vmem:[#allocation21_spill] sm:$0xff] }
  0x57   : >> { %v2545_v11 = vld [vmem:[#allocation20_spill] sm:$0xff]  ;;  %v2546_v10 = vld [vmem:[#allocation19_spill] sm:$0xff]  ;;  %v2547_v9 = vld [vmem:[#allocation18_spill] sm:$0xff] }
  0x58   : >> { %v2548_v5 = vld [vmem:[#allocation14_spill] sm:$0xff]  ;;  %v2550_v8 = vld [vmem:[#allocation17_spill] sm:$0xff]  ;;  %v2551_v7 = vld [vmem:[#allocation16_spill] sm:$0xff] }
  0x59   : >> { %v2549_v1 = vld [vmem:[#allocation10_spill] sm:$0xff]  ;;  %v2552_v4 = vld [vmem:[#allocation13_spill] sm:$0xff]  ;;  %318 = vperm.xlu2 %1518, %v2548_v5  }
  0x5a   : >> { %298 = vperm.xlu0 %1516, %v2549_v1   ;;  %v293_v45 = vld [vmem:[%s1901_s29] ss:$2 sm:$0x3] }
  0x5b   : >> { %v1913_v46 = vperm.slane %v293_v45, 0  ;;  %v1915_v47 = vperm.slane %v293_v45, 1 }
  0x5d   : >> { %313 = vperm.xlu1 %1517, %v2552_v4   ;;  %2555 = vst [vmem:[#allocation45_spill] sm:$0xff] %v1913_v46 }
  0x5e   : >> { %2556 = vst [vmem:[#allocation46_spill] sm:$0xff] %v1915_v47 }
  0x61   : >> { %323 = vperm.xlu2 %1518, %v2542_v6  }
  0x62   : >> { %303 = vperm.xlu0 %1516, %v2523_v2  }
  0x65   : >> { %333 = vperm.xlu1 %1517, %v2550_v8  }
  0x69   : >> { %338 = vperm.xlu2 %1518, %v2547_v9  }
  0x6a   : >> { %328 = vperm.xlu0 %1516, %v2551_v7  }
  0x6d   : >> { %348 = vperm.xlu1 %1517, %v2545_v11  }
  0x71   : >> { %353 = vperm.xlu2 %1518, %v2544_v12  }
  0x72   : >> { %343 = vperm.xlu0 %1516, %v2546_v10  }
  0x75   : >> { %363 = vperm.xlu1 %1517, %v2541_v14  }
  0x79   : >> { %368 = vperm.xlu2 %1518, %v2540_v15  }
  0x7a   : >> { %358 = vperm.xlu0 %1516, %v2543_v13  }
  0x7d   : >> { %378 = vperm.xlu1 %1517, %v2521_v17  }
  0x81   : >> { %383 = vperm.xlu2 %1518, %v2537_v18  }
  0x82   : >> { %373 = vperm.xlu0 %1516, %v2539_v16  }
  0x85   : >> { %393 = vperm.xlu1 %1517, %v2528_v20  }
  0x89   : >> { %398 = vperm.xlu2 %1518, %v2536_v21  }
  0x8a   : >> { %388 = vperm.xlu0 %1516, %v2533_v19  }
  0x8d   : >> { %408 = vperm.xlu1 %1517, %v2534_v23  }
  0x91   : >> { %413 = vperm.xlu2 %1518, %v2532_v24  }
  0x92   : >> { %403 = vperm.xlu0 %1516, %v2535_v22  }
  0x95   : >> { %423 = vperm.xlu1 %1517, %v2530_v26  }
  0x99   : >> { %428 = vperm.xlu2 %1518, %v2529_v27  }
  0x9a   : >> { %418 = vperm.xlu0 %1516, %v2531_v25  }
  0x9d   : >> { %448 = vperm.xlu1 %1517, %v2524_v31  }
  0xa1   : >> { %453 = vperm.xlu2 %1518, %v2522_v32  }
  0xa2   : >> { %433 = vperm.xlu0 %1516, %v2527_v28  }
  0xa5   : >> { %1519 = vset.pattern.permute.xlu1 %v1630_v35 }
  0xa6   : >> { %778 = vperm.xlu1 %1519, %v2539_v16  }
  0xa9   : >> { %1520 = vset.pattern.permute.xlu2 %v1630_v35 }
  0xaa   : >> { %443 = vperm.xlu0 %1516, %v2525_v30   ;;  %838 = vperm.xlu2 %1520, %v2524_v31  }
  0xae   : >> { %842 = vperm.xlu1 %1519, %v2522_v32  }
  0xb2   : >> { %1522 = vset.pattern.permute.xlu0 %v1630_v35  ;;  %1521 = vset.pattern.permute.xlu2 %v1629_v34 }
  0xb3   : >> { %v319_v36 = vpop.permute.xlu2 %318  ;;  %774 = vperm.xlu0 %1522, %v2540_v15   ;;  %438 = vperm.xlu2 %1521, %v2526_v29  }
  0xb4   : >> { %v469_v51 = vsub.f32 %v319_v36, %v1913_v46  ;;  %v470_v52 = vsub.f32 %v319_v36, %v1915_v47 }
  0xb6   : >> { %766 = vperm.xlu1 %1519, %v2543_v13   ;;  %v533_v55 = vand.u32 2147483647, %v469_v51  ;;  %v534_v57 = vand.u32 2147483647, %v470_v52 }
  0xb8   : >> { %v597_v0 = vsub.f32 1.0, %v533_v55 }
  0xbb   : >> { %v324_v37 = vpop.permute.xlu2 %323  ;;  %758 = vperm.xlu0 %1522, %v2545_v11   ;;  %1523 = vset.pattern.permute.xlu2 %v1630_v35  ;;  %v598_v35 = vsub.f32 1.0, %v534_v57 }
  0xbc   : >> { %770 = vperm.xlu2 %1523, %v2541_v14   ;;  %v471_v53 = vsub.f32 %v324_v37, %v1913_v46  ;;  %v472_v54 = vsub.f32 %v324_v37, %v1915_v47 }
  0xbe   : >> { %830 = vperm.xlu1 %1519, %v2526_v29   ;;  %v535_v59 = vand.u32 2147483647, %v471_v53  ;;  %v536_v61 = vand.u32 2147483647, %v472_v54  ;;  %v1945_v54 = vmax.f32 %v597_v0, 0.0 }
  0xc0   : >> { %v599_v45 = vsub.f32 1.0, %v535_v59  ;;  %v600_v52 = vsub.f32 1.0, %v536_v61  ;;  %2557 = vst [vmem:[#allocation47_spill] sm:$0xff] %v1945_v54 }
  0xc2   : >> { %v1949_v57 = vmax.f32 %v599_v45, 0.0  ;;  %v1958_v61 = vmax.f32 %v600_v52, 0.0 }
  0xc3   : >> { %v339_v38 = vpop.permute.xlu2 %338  ;;  %754 = vperm.xlu0 %1522, %v2546_v10  }
  0xc4   : >> { %834 = vperm.xlu2 %1523, %v2525_v30   ;;  %v477_v56 = vsub.f32 %v339_v38, %v1913_v46  ;;  %v478_v58 = vsub.f32 %v339_v38, %v1915_v47  ;;  %2559 = vst [vmem:[#allocation49_spill] sm:$0xff] %v1949_v57 }
  0xc5   : >> { %2560 = vst [vmem:[#allocation50_spill] sm:$0xff] %v1958_v61 }
  0xc6   : >> { %762 = vperm.xlu1 %1519, %v2544_v12   ;;  %v541_v34 = vand.u32 2147483647, %v477_v56  ;;  %v542_v36 = vand.u32 2147483647, %v478_v58 }
  0xc7   : >> { %v309_v40 = vpop.permute.xlu1 %308 }
  0xc8   : >> { %v465_v51 = vsub.f32 %v309_v40, %v1913_v46  ;;  %v466_v53 = vsub.f32 %v309_v40, %v1915_v47  ;;  %v606_v55 = vsub.f32 1.0, %v542_v36 }
  0xca   : >> { %v529_v58 = vand.u32 2147483647, %v465_v51  ;;  %v530_v0 = vand.u32 2147483647, %v466_v53 }
  0xcb   : >> { %v354_v39 = vpop.permute.xlu2 %353  ;;  %742 = vperm.xlu0 %1522, %v2551_v7   ;;  %v1947_v7 = vmax.f32 %v598_v35, 0.0 }
  0xcc   : >> { %v1894_v41 = vpop.permute.xlu0 %298  ;;  %822 = vperm.xlu2 %1523, %v2529_v27   ;;  %v483_v37 = vsub.f32 %v354_v39, %v1913_v46  ;;  %v484_v38 = vsub.f32 %v354_v39, %v1915_v47  ;;  %v594_v11 = vsub.f32 1.0, %v530_v0 }
  0xcd   : >> { %2553 = vst [vmem:[#allocation43_spill] sm:$0xff] %v1894_v41 }
  0xce   : >> { %826 = vperm.xlu1 %1519, %v2527_v28   ;;  %2558 = vst [vmem:[#allocation48_spill] sm:$0xff] %v1947_v7  ;;  %v547_v56 = vand.u32 2147483647, %v483_v37 }
  0xcf   : >> { %v1907_v43 = vpop.permute.xlu1 %313 }
  0xd0   : >> { %v468_v35 = vsub.f32 %v1907_v43, %v1915_v47  ;;  %v611_v52 = vsub.f32 1.0, %v547_v56 }
  0xd2   : >> { %v532_v13 = vand.u32 2147483647, %v468_v35  ;;  %v1990_v14 = vmax.f32 %v611_v52, 0.0 }
  0xd3   : >> { %v1904_v42 = vpop.permute.xlu2 %368  ;;  %810 = vperm.xlu0 %1522, %v2532_v24  }
  0xd4   : >> { %v1909_v44 = vpop.permute.xlu0 %303  ;;  %750 = vperm.xlu2 %1523, %v2547_v9   ;;  %v489_v39 = vsub.f32 %v1904_v42, %v1913_v46  ;;  %v490_v59 = vsub.f32 %v1904_v42, %v1915_v47  ;;  %v596_v52 = vsub.f32 1.0, %v532_v13 }
  0xd5   : >> { %2554 = vst [vmem:[#allocation44_spill] sm:$0xff] %v1909_v44 }
  0xd6   : >> { %814 = vperm.xlu1 %1519, %v2531_v25   ;;  %v554_v9 = vand.u32 2147483647, %v490_v59 }
  0xd7   : >> { %v1921_v49 = vpop.permute.xlu1 %333 }
  0xd8   : >> { %v476_v10 = vsub.f32 %v1921_v49, %v1915_v47 }
  0xda   : >> { %v540_v35 = vand.u32 2147483647, %v476_v10 }
  0xdb   : >> { %v1918_v48 = vpop.permute.xlu2 %383  ;;  %798 = vperm.xlu0 %1522, %v2536_v21  }
  0xdc   : >> { %v1923_v50 = vpop.permute.xlu0 %328  ;;  %818 = vperm.xlu2 %1523, %v2530_v26   ;;  %v495_v45 = vsub.f32 %v1918_v48, %v1913_v46  ;;  %v496_v51 = vsub.f32 %v1918_v48, %v1915_v47 }
  0xde   : >> { %746 = vperm.xlu1 %1519, %v2550_v8   ;;  %v548_v8 = vand.u32 2147483647, %v484_v38  ;;  %v461_v38 = vsub.f32 %v1894_v41, %v1913_v46  ;;  %v560_v56 = vand.u32 2147483647, %v496_v51 }
  0xdf   : >> { %v1936_v62 = vpop.permute.xlu1 %348 }
  0xe0   : >> { %v612_v53 = vsub.f32 1.0, %v548_v8  ;;  %v473_v8 = vsub.f32 %v1923_v50, %v1913_v46  ;;  %v481_v13 = vsub.f32 %v1936_v62, %v1913_v46  ;;  %v482_v12 = vsub.f32 %v1936_v62, %v1915_v47 }
  0xe2   : >> { %v537_v10 = vand.u32 2147483647, %v473_v8  ;;  %v545_v21 = vand.u32 2147483647, %v481_v13 }
  0xe3   : >> { %v1933_v60 = vpop.permute.xlu2 %398  ;;  %730 = vperm.xlu0 %1522, %v2552_v4   ;;  %v605_v4 = vsub.f32 1.0, %v541_v34  ;;  %v467_v34 = vsub.f32 %v1907_v43, %v1913_v46  ;;  %v1978_v43 = vmax.f32 %v606_v55, 0.0  ;;  %v559_v55 = vand.u32 2147483647, %v495_v45 }
  0xe4   : >> { %v1938_v63 = vpop.permute.xlu0 %343  ;;  %806 = vperm.xlu2 %1523, %v2534_v23   ;;  %v2001_v45 = vmax.f32 %v594_v11, 0.0  ;;  %v601_v62 = vsub.f32 1.0, %v537_v10 }
  0xe5   : >> { %v1969_v42 = vmax.f32 %v605_v4, 0.0  ;;  %v593_v4 = vsub.f32 1.0, %v529_v58  ;;  %v531_v48 = vand.u32 2147483647, %v467_v34  ;;  %v1992_v58 = vmax.f32 %v612_v53, 0.0 }
  0xe6   : >> { %734 = vperm.xlu1 %1519, %v2548_v5   ;;  %v553_v5 = vand.u32 2147483647, %v489_v39  ;;  %v618_v34 = vsub.f32 1.0, %v554_v9  ;;  %2563 = vst [vmem:[#allocation53_spill] sm:$0xff] %v2001_v45  ;;  %v501_v53 = vsub.f32 %v1933_v60, %v1913_v46  ;;  %v624_v9 = vsub.f32 1.0, %v560_v56 }
  0xe7   : >> { %v1965_v36 = vpop.permute.xlu1 %363  ;;  %v1996_v59 = vmax.f32 %v593_v4, 0.0  ;;  %v595_v51 = vsub.f32 1.0, %v531_v48  ;;  %v502_v4 = vsub.f32 %v1933_v60, %v1915_v47  ;;  %v479_v56 = vsub.f32 %v1938_v63, %v1913_v46 }
  0xe8   : >> { %v617_v0 = vsub.f32 1.0, %v553_v5  ;;  %v623_v5 = vsub.f32 1.0, %v559_v55  ;;  %v2019_v16 = vmax.f32 %v618_v34, 0.0  ;;  %v604_v55 = vsub.f32 1.0, %v540_v35 }
  0xe9   : >> { %2562 = vst [vmem:[#allocation52_spill] sm:$0xff] %v1996_v59  ;;  %v2023_v8 = vmax.f32 %v595_v51, 0.0  ;;  %v2025_v60 = vmax.f32 %v596_v52, 0.0  ;;  %v543_v51 = vand.u32 2147483647, %v479_v56  ;;  %v488_v10 = vsub.f32 %v1965_v36, %v1915_v47 }
  0xea   : >> { %v2017_v15 = vmax.f32 %v617_v0, 0.0  ;;  %v566_v0 = vand.u32 2147483647, %v502_v4  ;;  %v2035_v23 = vmax.f32 %v604_v55, 0.0 }
  0xeb   : >> { %v1956_v40 = vpop.permute.xlu2 %413  ;;  %718 = vperm.xlu0 %1522, %v2549_v1   ;;  %v475_v1 = vsub.f32 %v1921_v49, %v1913_v46  ;;  %v474_v49 = vsub.f32 %v1923_v50, %v1915_v47  ;;  %2564 = vst [vmem:[#allocation54_spill] sm:$0xff] %v2023_v8  ;;  %v552_v27 = vand.u32 2147483647, %v488_v10 }
  0xec   : >> { %v1967_v37 = vpop.permute.xlu0 %358  ;;  %738 = vperm.xlu2 %1523, %v2542_v6   ;;  %v1986_v6 = vand.u32 2147483647, %v461_v38  ;;  %2565 = vst [vmem:[#allocation55_spill] sm:$0xff] %v2025_v60  ;;  %v507_v52 = vsub.f32 %v1956_v40, %v1913_v46 }
  0xed   : >> { %v539_v39 = vand.u32 2147483647, %v475_v1  ;;  %v538_v48 = vand.u32 2147483647, %v474_v49  ;;  %v480_v49 = vsub.f32 %v1938_v63, %v1915_v47  ;;  %2569 = vst [vmem:[#allocation59_spill] sm:$0xff] %v2035_v23  ;;  %v508_v63 = vsub.f32 %v1956_v40, %v1915_v47 }
  0xee   : >> { %2561 = vst [vmem:[#allocation51_spill] sm:$0xff] %v1986_v6  ;;  %802 = vperm.xlu1 %1519, %v2535_v22   ;;  %v546_v22 = vand.u32 2147483647, %v482_v12  ;;  %v485_v40 = vsub.f32 %v1967_v37, %v1913_v46  ;;  %v486_v13 = vsub.f32 %v1967_v37, %v1915_v47 }
  0xef   : >> { %v2006_v1 = vpop.permute.xlu1 %378  ;;  %v603_v11 = vsub.f32 1.0, %v539_v39  ;;  %v565_v39 = vand.u32 2147483647, %v501_v53  ;;  %v602_v35 = vsub.f32 1.0, %v538_v48  ;;  %v630_v48 = vsub.f32 1.0, %v566_v0 }
  0xf0   : >> { %v571_v0 = vand.u32 2147483647, %v507_v52  ;;  %v494_v52 = vsub.f32 %v2006_v1, %v1915_v47 }
  0xf1   : >> { %v2033_v34 = vmax.f32 %v603_v11, 0.0  ;;  %v629_v53 = vsub.f32 1.0, %v565_v39  ;;  %v2050_v11 = vmax.f32 %v601_v62, 0.0  ;;  %v2059_v56 = vmax.f32 %v602_v35, 0.0 }
  0xf2   : >> { %v610_v39 = vsub.f32 1.0, %v546_v22  ;;  %v607_v62 = vsub.f32 1.0, %v543_v51  ;;  %v549_v35 = vand.u32 2147483647, %v485_v40  ;;  %v493_v22 = vsub.f32 %v2006_v1, %v1913_v46 }
  0xf3   : >> { %v1999_v38 = vpop.permute.xlu2 %428  ;;  %786 = vperm.xlu0 %1522, %v2537_v18   ;;  %v2031_v18 = vmax.f32 %v624_v9, 0.0  ;;  %2568 = vst [vmem:[#allocation58_spill] sm:$0xff] %v2033_v34  ;;  %v487_v9 = vsub.f32 %v1965_v36, %v1913_v46  ;;  %v609_v36 = vsub.f32 1.0, %v545_v21  ;;  %v2065_v25 = vmax.f32 %v629_v53, 0.0 }
  0xf4   : >> { %v2008_v50 = vpop.permute.xlu0 %373  ;;  %726 = vperm.xlu2 %1523, %v2538_v3   ;;  %v2029_v3 = vmax.f32 %v623_v5, 0.0  ;;  %v544_v5 = vand.u32 2147483647, %v480_v49  ;;  %2570 = vst [vmem:[#allocation60_spill] sm:$0xff] %v2050_v11  ;;  %v513_v49 = vsub.f32 %v1999_v38, %v1913_v46  ;;  %v514_v24 = vsub.f32 %v1999_v38, %v1915_v47 }
  0xf5   : >> { %2567 = vst [vmem:[#allocation57_spill] sm:$0xff] %v2031_v18  ;;  %v551_v26 = vand.u32 2147483647, %v487_v9  ;;  %v550_v21 = vand.u32 2147483647, %v486_v13  ;;  %v2071_v28 = vmax.f32 %v609_v36, 0.0  ;;  %v491_v38 = vsub.f32 %v2008_v50, %v1913_v46 }
  0xf6   : >> { %2566 = vst [vmem:[#allocation56_spill] sm:$0xff] %v2029_v3  ;;  %790 = vperm.xlu1 %1519, %v2533_v19   ;;  %v572_v19 = vand.u32 2147483647, %v508_v63  ;;  %v608_v37 = vsub.f32 1.0, %v544_v5  ;;  %v577_v51 = vand.u32 2147483647, %v513_v49 }
  0xf7   : >> { %v2046_v12 = vpop.permute.xlu1 %393  ;;  %2571 = vst [vmem:[#allocation61_spill] sm:$0xff] %v2059_v56  ;;  %v1425_v63 = vld [vmem:[%s1901_s29 + $0x1] ss:$2 sm:$0x3]  ;;  %v2078_v53 = vmax.f32 %v610_v39, 0.0  ;;  %v635_v5 = vsub.f32 1.0, %v571_v0  ;;  %v492_v39 = vsub.f32 %v2008_v50, %v1915_v47 }
  0xf8   : >> { %2572 = vst [vmem:[#allocation62_spill] sm:$0xff] %v2065_v25  ;;  %v636_v9 = vsub.f32 1.0, %v572_v19  ;;  %v578_v10 = vand.u32 2147483647, %v514_v24  ;;  %v2083_v40 = vmax.f32 %v608_v37, 0.0  ;;  %v615_v13 = vsub.f32 1.0, %v551_v26 }
  0xf9   : >> { %v616_v36 = vsub.f32 1.0, %v552_v27  ;;  %v613_v1 = vsub.f32 1.0, %v549_v35  ;;  %v614_v30 = vsub.f32 1.0, %v550_v21  ;;  %v557_v31 = vand.u32 2147483647, %v493_v22 }
  0xfa   : >> { %v641_v24 = vsub.f32 1.0, %v577_v51  ;;  %v558_v0 = vand.u32 2147483647, %v494_v52  ;;  %v2090_v37 = vmax.f32 %v635_v5, 0.0  ;;  %v2092_v26 = vmax.f32 %v636_v9, 0.0 }
  0xfb   : >> { %v2056_v55 = vpop.permute.xlu2 %453  ;;  %v642_v27 = vsub.f32 1.0, %v578_v10  ;;  %v2094_v32 = vperm.slane %v1425_v63, 1  ;;  %v2096_v35 = vmax.f32 %v615_v13, 0.0  ;;  %v2098_v21 = vmax.f32 %v616_v36, 0.0 }
  0xfc   : >> { %v2048_v4 = vpop.permute.xlu0 %388  ;;  %794 = vperm.xlu2 %1523, %v2528_v20   ;;  %v2067_v20 = vmax.f32 %v630_v48, 0.0  ;;  %v2081_v48 = vmax.f32 %v607_v62, 0.0  ;;  %v2088_v62 = vperm.slane %v1425_v63, 0  ;;  %2574 = vst [vmem:[#allocation64_spill] sm:$0xff] %v2092_v26  ;;  %v523_v50 = vsub.f32 %v2056_v55, %v1913_v46 }
  0xfd   : >> { %v524_v22 = vsub.f32 %v2056_v55, %v1915_v47  ;;  %v2104_v51 = vmax.f32 %v613_v1, 0.0  ;;  %v2106_v52 = vmax.f32 %v614_v30, 0.0  ;;  %v556_v5 = vand.u32 2147483647, %v492_v39 }
  0xfe   : >> { %2573 = vst [vmem:[#allocation63_spill] sm:$0xff] %v2067_v20  ;;  %722 = vperm.xlu1 %1519, %v2523_v2   ;;  %v555_v2 = vand.u32 2147483647, %v491_v38  ;;  %v621_v38 = vsub.f32 1.0, %v557_v31  ;;  %v2108_v9 = vmax.f32 %v641_v24, 0.0  ;;  %v622_v63 = vsub.f32 1.0, %v558_v0 }
  0xff   : >> { %v409_v49 = vpop.permute.xlu1 %408  ;;  %v2111_v36 = vmax.f32 %v642_v27, 0.0  ;;  %v500_v55 = vsub.f32 %v2046_v12, %v1915_v47  ;;  %v587_v30 = vand.u32 2147483647, %v523_v50  ;;  %v588_v33 = vand.u32 2147483647, %v524_v22 }
 0x100   : >> { %v619_v10 = vsub.f32 1.0, %v555_v2  ;;  %v505_v13 = vsub.f32 %v409_v49, %v1913_v46  ;;  %v506_v1 = vsub.f32 %v409_v49, %v1915_v47  ;;  %v497_v31 = vsub.f32 %v2048_v4, %v1913_v46 }
 0x101   : >> { %v2121_v0 = vmax.f32 %v621_v38, 0.0  ;;  %v620_v27 = vsub.f32 1.0, %v556_v5  ;;  %v498_v6 = vsub.f32 %v2048_v4, %v1915_v47  ;;  %v2134_v38 = vand.u32 2147483647, %v500_v55 }
 0x102   : >> { %v569_v49 = vand.u32 2147483647, %v505_v13  ;;  %v570_v5 = vand.u32 2147483647, %v506_v1  ;;  %v652_v4 = vsub.f32 1.0, %v588_v33 }
 0x103   : >> { %2575 = vst [vmem:[#allocation65_spill] sm:$0xff] %v2121_v0  ;;  %v651_v0 = vsub.f32 1.0, %v587_v30  ;;  %v2136_v25 = vand.u32 2147483647, %v497_v31  ;;  %v2140_v13 = vmax.f32 %v620_v27, 0.0 }
 0x104   : >> { %v404_v29 = vpop.permute.xlu0 %403  ;;  %782 = vperm.xlu2 %1523, %v2521_v17   ;;  %v839_v19 = vpop.permute.xlu2 %838  ;;  %v499_v17 = vsub.f32 %v2046_v12, %v1913_v46  ;;  %v2126_v12 = vmax.f32 %v622_v63, 0.0  ;;  %2578 = vst [vmem:[#allocation68_spill] sm:$0xff] %v2134_v38  ;;  %v2138_v63 = vmax.f32 %v619_v10, 0.0  ;;  %v633_v60 = vsub.f32 1.0, %v569_v49 }
 0x105   : >> { %v503_v39 = vsub.f32 %v404_v29, %v1913_v46  ;;  %v504_v41 = vsub.f32 %v404_v29, %v1915_v47  ;;  %v910_v50 = vsub.f32 %v839_v19, %v2088_v62  ;;  %v911_v22 = vsub.f32 %v839_v19, %v2094_v32  ;;  %2579 = vst [vmem:[#allocation69_spill] sm:$0xff] %v2136_v25 }
 0x106   : >> { %2576 = vst [vmem:[#allocation66_spill] sm:$0xff] %v2126_v12  ;;  %v2132_v20 = vand.u32 2147483647, %v499_v17  ;;  %v2142_v12 = vand.u32 2147483647, %v498_v6  ;;  %v634_v33 = vsub.f32 1.0, %v570_v5 }
 0x107   : >> { %v424_v2 = vpop.permute.xlu1 %423  ;;  %v567_v29 = vand.u32 2147483647, %v503_v39  ;;  %v568_v19 = vand.u32 2147483647, %v504_v41  ;;  %v974_v45 = vand.u32 2147483647, %v910_v50 }
 0x108   : >> { %2577 = vst [vmem:[#allocation67_spill] sm:$0xff] %v2132_v20  ;;  %v975_v3 = vand.u32 2147483647, %v911_v22  ;;  %v511_v17 = vsub.f32 %v424_v2, %v1913_v46  ;;  %v512_v30 = vsub.f32 %v424_v2, %v1915_v47  ;;  %v2148_v31 = vmax.f32 %v651_v0, 0.0 }
 0x109   : >> { %2580 = vst [vmem:[#allocation70_spill] sm:$0xff] %v2142_v12  ;;  %v2150_v10 = vmax.f32 %v652_v4, 0.0  ;;  %v631_v39 = vsub.f32 1.0, %v567_v29  ;;  %v632_v50 = vsub.f32 1.0, %v568_v19  ;;  %v2156_v1 = vmax.f32 %v633_v60, 0.0 }
 0x10a   : >> { %v1038_v5 = vsub.f32 1.0, %v974_v45  ;;  %v1039_v2 = vsub.f32 1.0, %v975_v3  ;;  %v575_v0 = vand.u32 2147483647, %v511_v17  ;;  %v2158_v38 = vmax.f32 %v634_v33, 0.0 }
 0x10b   : >> { %2581 = vst [vmem:[#allocation71_spill] sm:$0xff] %v2156_v1  ;;  %v576_v4 = vand.u32 2147483647, %v512_v30  ;;  %v2162_v20 = vmax.f32 %v631_v39, 0.0  ;;  %v2169_v33 = vmax.f32 %v632_v50, 0.0 }
 0x10c   : >> { %v419_v24 = vpop.permute.xlu0 %418  ;;  %2582 = vst [vmem:[#allocation72_spill] sm:$0xff] %v2158_v38  ;;  %v2171_v30 = vmax.f32 %v1038_v5, 0.0  ;;  %v2174_v12 = vmax.f32 %v1039_v2, 0.0 }
 0x10d   : >> { %v439_v18 = vpop.permute.xlu2 %438  ;;  %v509_v22 = vsub.f32 %v419_v24, %v1913_v46  ;;  %v510_v55 = vsub.f32 %v419_v24, %v1915_v47  ;;  %2583 = vst [vmem:[#allocation73_spill] sm:$0xff] %v2162_v20  ;;  %v640_v20 = vsub.f32 1.0, %v576_v4 }
 0x10e   : >> { %v517_v6 = vsub.f32 %v439_v18, %v1913_v46  ;;  %v518_v29 = vsub.f32 %v439_v18, %v1915_v47  ;;  %2584 = vst [vmem:[#allocation74_spill] sm:$0xff] %v2169_v33  ;;  %v639_v18 = vsub.f32 1.0, %v575_v0 }
 0x10f   : >> { %v449_v41 = vpop.permute.xlu1 %448  ;;  %v573_v24 = vand.u32 2147483647, %v509_v22  ;;  %v574_v45 = vand.u32 2147483647, %v510_v55 }
 0x110   : >> { %v521_v19 = vsub.f32 %v449_v41, %v1913_v46  ;;  %v522_v49 = vsub.f32 %v449_v41, %v1915_v47  ;;  %v581_v8 = vand.u32 2147483647, %v517_v6  ;;  %v582_v41 = vand.u32 2147483647, %v518_v29 }
 0x111   : >> { %v637_v54 = vsub.f32 1.0, %v573_v24  ;;  %v638_v50 = vsub.f32 1.0, %v574_v45  ;;  %v2178_v0 = vmax.f32 %v639_v18, 0.0 }
 0x112   : >> { %v585_v55 = vand.u32 2147483647, %v521_v19  ;;  %v586_v59 = vand.u32 2147483647, %v522_v49  ;;  %v645_v4 = vsub.f32 1.0, %v581_v8  ;;  %v646_v29 = vsub.f32 1.0, %v582_v41 }
 0x113   : >> { %v2189_v57 = vmax.f32 %v638_v50, 0.0 }
 0x114   : >> { %v434_v27 = vpop.permute.xlu0 %433  ;;  %v649_v24 = vsub.f32 1.0, %v585_v55  ;;  %v650_v45 = vsub.f32 1.0, %v586_v59 }
 0x115   : >> { %v515_v60 = vsub.f32 %v434_v27, %v1913_v46  ;;  %v516_v3 = vsub.f32 %v434_v27, %v1915_v47 }
 0x116   : >> { %v771_v25 = vpop.permute.xlu2 %770  ;;  %v713_v55 = vmax.f32 %v649_v24, 0.0  ;;  %v714_v59 = vmax.f32 %v650_v45, 0.0 }
 0x117   : >> { %v876_v17 = vsub.f32 %v771_v25, %v2088_v62  ;;  %v877_v39 = vsub.f32 %v771_v25, %v2094_v32  ;;  %v579_v27 = vand.u32 2147483647, %v515_v60  ;;  %v580_v33 = vand.u32 2147483647, %v516_v3 }
 0x118   : >> { %v779_v61 = vpop.permute.xlu1 %778  ;;  %v2184_v60 = vmax.f32 %v640_v20, 0.0 }
 0x119   : >> { %v940_v5 = vand.u32 2147483647, %v876_v17  ;;  %v941_v25 = vand.u32 2147483647, %v877_v39  ;;  %v880_v6 = vsub.f32 %v779_v61, %v2088_v62  ;;  %v881_v49 = vsub.f32 %v779_v61, %v2094_v32 }
 0x11a   : >> { %v643_v3 = vsub.f32 1.0, %v579_v27  ;;  %v644_v17 = vsub.f32 1.0, %v580_v33  ;;  %v2193_v61 = vmax.f32 %v646_v29, 0.0 }
 0x11b   : >> { %v1004_v18 = vsub.f32 1.0, %v940_v5  ;;  %v944_v44 = vand.u32 2147483647, %v880_v6  ;;  %v1005_v8 = vsub.f32 1.0, %v941_v25 }
 0x11c   : >> { %v444_v7 = vpop.permute.xlu0 %443  ;;  %v2195_v27 = vmax.f32 %v643_v3, 0.0  ;;  %v2198_v5 = vmax.f32 %v644_v17, 0.0 }
 0x11d   : >> { %v519_v2 = vsub.f32 %v444_v7, %v1913_v46  ;;  %v520_v22 = vsub.f32 %v444_v7, %v1915_v47  ;;  %v2187_v46 = vmax.f32 %v637_v54, 0.0  ;;  %v2191_v7 = vmax.f32 %v645_v4, 0.0 }
 0x11e   : >> { %v835_v19 = vpop.permute.xlu2 %834  ;;  %v945_v47 = vand.u32 2147483647, %v881_v49  ;;  %v1068_v54 = vmax.f32 %v1004_v18, 0.0  ;;  %v1008_v6 = vsub.f32 1.0, %v944_v44  ;;  %v1069_v25 = vmax.f32 %v1005_v8, 0.0 }
 0x11f   : >> { %v908_v39 = vsub.f32 %v835_v19, %v2088_v62  ;;  %v583_v41 = vand.u32 2147483647, %v519_v2  ;;  %v584_v20 = vand.u32 2147483647, %v520_v22  ;;  %v909_v33 = vsub.f32 %v835_v19, %v2094_v32 }
 0x120   : >> { %v843_v23 = vpop.permute.xlu1 %842  ;;  %v1009_v24 = vsub.f32 1.0, %v945_v47  ;;  %v1166_v44 = vmul.f32 %v2171_v30, %v713_v55  ;;  %v2207_v47 = vmul.f32 %v1068_v54, %v2096_v35 }
 0x121   : >> { %v972_v50 = vand.u32 2147483647, %v908_v39  ;;  %v647_v2 = vsub.f32 1.0, %v583_v41  ;;  %v912_v4 = vsub.f32 %v843_v23, %v2088_v62  ;;  %v913_v29 = vsub.f32 %v843_v23, %v2094_v32 }
 0x122   : >> { %v648_v49 = vsub.f32 1.0, %v584_v20  ;;  %v973_v17 = vand.u32 2147483647, %v909_v33  ;;  %v1072_v39 = vmax.f32 %v1008_v6, 0.0  ;;  %v1167_v23 = vmul.f32 %v2174_v12, %v714_v59 }
 0x123   : >> { %v976_v56 = vand.u32 2147483647, %v912_v4  ;;  %v977_v18 = vand.u32 2147483647, %v913_v29  ;;  %v1036_v8 = vsub.f32 1.0, %v972_v50  ;;  %v711_v20 = vmax.f32 %v647_v2, 0.0 }
 0x124   : >> { %v2210_v33 = vmul.f32 %v1069_v25, %v2098_v21  ;;  %v2212_v4 = vmax.f32 %v648_v49, 0.0  ;;  %v1073_v30 = vmax.f32 %v1009_v24, 0.0  ;;  %v1037_v55 = vsub.f32 1.0, %v973_v17 }
 0x125   : >> { %v775_v22 = vpop.permute.xlu0 %774  ;;  %v1040_v11 = vsub.f32 1.0, %v976_v56  ;;  %v1041_v26 = vsub.f32 1.0, %v977_v18  ;;  %v1100_v50 = vmax.f32 %v1036_v8, 0.0  ;;  %v1136_v12 = vmul.f32 %v1072_v39, %v2138_v63 }
 0x126   : >> { %v878_v45 = vsub.f32 %v775_v22, %v2088_v62  ;;  %v879_v3 = vsub.f32 %v775_v22, %v2094_v32  ;;  %v823_v19 = vpop.permute.xlu2 %822  ;;  %v1101_v17 = vmax.f32 %v1037_v55, 0.0 }
 0x127   : >> { %v1104_v6 = vmax.f32 %v1040_v11, 0.0  ;;  %v902_v56 = vsub.f32 %v823_v19, %v2088_v62  ;;  %v1105_v35 = vmax.f32 %v1041_v26, 0.0  ;;  %v903_v18 = vsub.f32 %v823_v19, %v2094_v32 }
 0x128   : >> { %v942_v41 = vand.u32 2147483647, %v878_v45  ;;  %v943_v34 = vand.u32 2147483647, %v879_v3  ;;  %v767_v45 = vpop.permute.xlu1 %766 }
 0x129   : >> { %v874_v54 = vsub.f32 %v767_v45, %v2088_v62  ;;  %v2230_v19 = vand.u32 2147483647, %v903_v18 }
 0x12a   : >> { %v1006_v38 = vsub.f32 1.0, %v942_v41  ;;  %v1007_v22 = vsub.f32 1.0, %v943_v34  ;;  %v875_v34 = vsub.f32 %v767_v45, %v2094_v32  ;;  %v966_v41 = vand.u32 2147483647, %v902_v56 }
 0x12b   : >> { %v938_v24 = vand.u32 2147483647, %v874_v54 }
 0x12c   : >> { %v1070_v29 = vmax.f32 %v1006_v38, 0.0  ;;  %v1071_v59 = vmax.f32 %v1007_v22, 0.0  ;;  %v1168_v38 = vmul.f32 %v1104_v6, %v2148_v31  ;;  %v939_v3 = vand.u32 2147483647, %v875_v34 }
 0x12d   : >> { %v759_v21 = vpop.permute.xlu0 %758  ;;  %v1002_v22 = vsub.f32 1.0, %v938_v24  ;;  %v1137_v31 = vmul.f32 %v1073_v30, %v2140_v13  ;;  %v1169_v6 = vmul.f32 %v1105_v35, %v2150_v10  ;;  %v2228_v34 = vmul.f32 %v1100_v50, %v711_v20 }
 0x12e   : >> { %v870_v25 = vsub.f32 %v759_v21, %v2088_v62  ;;  %v871_v2 = vsub.f32 %v759_v21, %v2094_v32  ;;  %v751_v49 = vpop.permute.xlu2 %750  ;;  %v1134_v11 = vmul.f32 %v1070_v29, %v2017_v15  ;;  %v1200_v8 = vpack.c.bf16 %v1168_v38, %v1166_v44 }
 0x12f   : >> { %v866_v63 = vsub.f32 %v751_v49, %v2088_v62  ;;  %v867_v26 = vsub.f32 %v751_v49, %v2094_v32  ;;  %v1003_v45 = vsub.f32 1.0, %v939_v3  ;;  %v1135_v15 = vmul.f32 %v1071_v59, %v2019_v16 }
 0x130   : >> { %v1184_v39 = vpack.c.bf16 %v1136_v12, %v1134_v11  ;;  %v934_v21 = vand.u32 2147483647, %v870_v25  ;;  %v935_v1 = vand.u32 2147483647, %v871_v2  ;;  %1222 = vmatpush.bf16.msra.mxu1 %v1200_v8  ;;  %v1066_v29 = vmax.f32 %v1002_v22, 0.0  ;;  %v831_v25 = vpop.permute.xlu1 %830 }
 0x131   : >> { %v930_v54 = vand.u32 2147483647, %v866_v63  ;;  %v931_v55 = vand.u32 2147483647, %v867_v26  ;;  %v1067_v44 = vmax.f32 %v1003_v45, 0.0  ;;  %v1185_v56 = vpack.c.bf16 %v1137_v31, %v1135_v15 }
 0x132   : >> { %1209 = vmatpush.bf16.msra.mxu0 %v1184_v39  ;;  %v1201_v12 = vpack.c.bf16 %v1169_v6, %v1167_v23  ;;  %v1030_v2 = vsub.f32 1.0, %v966_v41  ;;  %v998_v49 = vsub.f32 1.0, %v934_v21  ;;  %v906_v11 = vsub.f32 %v831_v25, %v2088_v62 }
 0x133   : >> { %v907_v16 = vsub.f32 %v831_v25, %v2094_v32  ;;  %v999_v30 = vsub.f32 1.0, %v935_v1  ;;  %1235 = vmatpush.bf16.msra.mxu2 %v1185_v56  ;;  %v1130_v35 = vmul.f32 %v1066_v29, %v2104_v51  ;;  %v994_v59 = vsub.f32 1.0, %v930_v54 }
 0x134   : >> { %1248 = vmatpush.bf16.msra.mxu3 %v1201_v12  ;;  %v995_v23 = vsub.f32 1.0, %v931_v55  ;;  %v970_v38 = vand.u32 2147483647, %v906_v11  ;;  %v1131_v1 = vmul.f32 %v1067_v44, %v2106_v52  ;;  %v1165_v41 = vmul.f32 %v1101_v17, %v2212_v4 }
 0x135   : >> { %v755_v13 = vpop.permute.xlu0 %754  ;;  %v971_v24 = vand.u32 2147483647, %v907_v16  ;;  %v1182_v26 = vpack.c.bf16 %v2207_v47, %v1130_v35  ;;  %v1031_v22 = vsub.f32 1.0, %v2230_v19  ;;  %v2242_v45 = vmax.f32 %v1030_v2, 0.0 }
 0x136   : >> { %v868_v10 = vsub.f32 %v755_v13, %v2088_v62  ;;  %v869_v20 = vsub.f32 %v755_v13, %v2094_v32  ;;  %v819_v50 = vpop.permute.xlu2 %818  ;;  %v1034_v18 = vsub.f32 1.0, %v970_v38  ;;  %v1183_v21 = vpack.c.bf16 %v2210_v33, %v1131_v1 }
 0x137   : >> { %v900_v63 = vsub.f32 %v819_v50, %v2088_v62  ;;  %v1035_v39 = vsub.f32 1.0, %v971_v24  ;;  %1210 = vmatpush.bf16.msra.mxu0 %v1182_v26  ;;  %v1062_v15 = vmax.f32 %v998_v49, 0.0  ;;  %v901_v47 = vsub.f32 %v819_v50, %v2094_v32 }
 0x138   : >> { %v932_v3 = vand.u32 2147483647, %v868_v10  ;;  %v933_v8 = vand.u32 2147483647, %v869_v20  ;;  %v1098_v31 = vmax.f32 %v1034_v18, 0.0  ;;  %v1063_v29 = vmax.f32 %v999_v30, 0.0  ;;  %1236 = vmatpush.bf16.msra.mxu2 %v1183_v21  ;;  %v763_v44 = vpop.permute.xlu1 %762 }
 0x139   : >> { %v1099_v6 = vmax.f32 %v1035_v39, 0.0  ;;  %v1058_v52 = vmax.f32 %v994_v59, 0.0  ;;  %v1059_v54 = vmax.f32 %v995_v23, 0.0  ;;  %v964_v55 = vand.u32 2147483647, %v900_v63 }
 0x13a   : >> { %v996_v51 = vsub.f32 1.0, %v932_v3  ;;  %v997_v4 = vsub.f32 1.0, %v933_v8  ;;  %v872_v56 = vsub.f32 %v763_v44, %v2088_v62  ;;  %v873_v12 = vsub.f32 %v763_v44, %v2094_v32 }
 0x13b   : >> { %v1162_v11 = vmul.f32 %v1098_v31, %v2191_v7  ;;  %v1163_v16 = vmul.f32 %v1099_v6, %v2193_v61  ;;  %v965_v13 = vand.u32 2147483647, %v901_v47  ;;  %v1028_v26 = vsub.f32 1.0, %v964_v55 }
 0x13c   : >> { %v1060_v17 = vmax.f32 %v996_v51, 0.0  ;;  %v936_v30 = vand.u32 2147483647, %v872_v56  ;;  %v937_v10 = vand.u32 2147483647, %v873_v12  ;;  %v1061_v38 = vmax.f32 %v997_v4, 0.0 }
 0x13d   : >> { %v743_v25 = vpop.permute.xlu0 %742  ;;  %v1198_v59 = vpack.c.bf16 %v2228_v34, %v1162_v11  ;;  %v1199_v23 = vpack.c.bf16 %v1165_v41, %v1163_v16  ;;  %v1126_v7 = vmul.f32 %v1062_v15, %v2071_v28  ;;  %v1122_v61 = vmul.f32 %v1058_v52, %v1969_v42 }
 0x13e   : >> { %v862_v33 = vsub.f32 %v743_v25, %v2088_v62  ;;  %v863_v2 = vsub.f32 %v743_v25, %v2094_v32  ;;  %v807_v49 = vpop.permute.xlu2 %806  ;;  %v1000_v24 = vsub.f32 1.0, %v936_v30  ;;  %v1001_v3 = vsub.f32 1.0, %v937_v10 }
 0x13f   : >> { %v894_v20 = vsub.f32 %v807_v49, %v2088_v62  ;;  %v895_v35 = vsub.f32 %v807_v49, %v2094_v32  ;;  %1223 = vmatpush.bf16.msra.mxu1 %v1198_v59  ;;  %1249 = vmatpush.bf16.msra.mxu3 %v1199_v23  ;;  %v1124_v1 = vmul.f32 %v1060_v17, %v2081_v48  ;;  %v1029_v18 = vsub.f32 1.0, %v965_v13 }
 0x140   : >> { %v926_v50 = vand.u32 2147483647, %v862_v33  ;;  %v927_v63 = vand.u32 2147483647, %v863_v2  ;;  %v1064_v39 = vmax.f32 %v1000_v24, 0.0  ;;  %v1065_v8 = vmax.f32 %v1001_v3, 0.0  ;;  %v827_v31 = vpop.permute.xlu1 %826 }
 0x141   : >> { %v1127_v51 = vmul.f32 %v1063_v29, %v2078_v53  ;;  %v958_v41 = vand.u32 2147483647, %v894_v20  ;;  %v2259_v21 = vand.u32 2147483647, %v895_v35  ;;  %v1178_v6 = vpack.c.bf16 %v1124_v1, %v1122_v61 }
 0x142   : >> { %v990_v34 = vsub.f32 1.0, %v926_v50  ;;  %v991_v47 = vsub.f32 1.0, %v927_v63  ;;  %v904_v55 = vsub.f32 %v827_v31, %v2088_v62  ;;  %v905_v28 = vsub.f32 %v827_v31, %v2094_v32 }
 0x143   : >> { %v1125_v42 = vmul.f32 %v1061_v38, %v2083_v40  ;;  %v1128_v53 = vmul.f32 %v1064_v39, %v1990_v14  ;;  %v1129_v29 = vmul.f32 %v1065_v8, %v1992_v58  ;;  %v1123_v12 = vmul.f32 %v1059_v54, %v1978_v43 }
 0x144   : >> { %v968_v4 = vand.u32 2147483647, %v904_v55  ;;  %v969_v17 = vand.u32 2147483647, %v905_v28  ;;  %v1095_v49 = vmax.f32 %v1031_v22, 0.0  ;;  %v1092_v11 = vmax.f32 %v1028_v26, 0.0 }
 0x145   : >> { %v811_v15 = vpop.permute.xlu0 %810  ;;  %v1180_v2 = vpack.c.bf16 %v1128_v53, %v1126_v7  ;;  %v1181_v40 = vpack.c.bf16 %v1129_v29, %v1127_v51  ;;  %v1093_v14 = vmax.f32 %v1029_v18, 0.0  ;;  %v1022_v30 = vsub.f32 1.0, %v958_v41 }
 0x146   : >> { %v896_v48 = vsub.f32 %v811_v15, %v2088_v62  ;;  %v897_v52 = vsub.f32 %v811_v15, %v2094_v32  ;;  %v739_v44 = vpop.permute.xlu2 %738  ;;  %v1032_v16 = vsub.f32 1.0, %v968_v4  ;;  %v1033_v13 = vsub.f32 1.0, %v969_v17 }
 0x147   : >> { %v860_v56 = vsub.f32 %v739_v44, %v2088_v62  ;;  %v861_v33 = vsub.f32 %v739_v44, %v2094_v32  ;;  %1211 = vmatpush.bf16.msra.mxu0 %v1180_v2  ;;  %1237 = vmatpush.bf16.msra.mxu2 %v1181_v40  ;;  %v1179_v10 = vpack.c.bf16 %v1125_v42, %v1123_v12  ;;  %v2273_v20 = vmax.f32 %v990_v34, 0.0 }
 0x148   : >> { %v960_v25 = vand.u32 2147483647, %v896_v48  ;;  %v961_v58 = vand.u32 2147483647, %v897_v52  ;;  %v2275_v43 = vmax.f32 %v991_v47, 0.0  ;;  %v1023_v54 = vsub.f32 1.0, %v2259_v21  ;;  %v815_v23 = vpop.permute.xlu1 %814 }
 0x149   : >> { %v1096_v50 = vmax.f32 %v1032_v16, 0.0  ;;  %v1097_v35 = vmax.f32 %v1033_v13, 0.0  ;;  %v924_v19 = vand.u32 2147483647, %v860_v56  ;;  %v2278_v22 = vand.u32 2147483647, %v861_v33 }
 0x14a   : >> { %v1024_v59 = vsub.f32 1.0, %v960_v25  ;;  %v898_v38 = vsub.f32 %v815_v23, %v2088_v62  ;;  %v899_v24 = vsub.f32 %v815_v23, %v2094_v32  ;;  %v1158_v63 = vmul.f32 %v2242_v45, %v2108_v9 }
 0x14b   : >> { %v1159_v26 = vmul.f32 %v1095_v49, %v2111_v36  ;;  %v1025_v7 = vsub.f32 1.0, %v961_v58  ;;  %1212 = vmatpush.bf16.msra.mxu0 %v1178_v6  ;;  %1238 = vmatpush.bf16.msra.mxu2 %v1179_v10  ;;  %v1160_v39 = vmul.f32 %v1096_v50, %v2195_v27  ;;  %v1161_v36 = vmul.f32 %v1097_v35, %v2198_v5 }
 0x14c   : >> { %v962_v8 = vand.u32 2147483647, %v898_v38  ;;  %v963_v51 = vand.u32 2147483647, %v899_v24  ;;  %v1086_v31 = vmax.f32 %v1022_v30, 0.0  ;;  %v1088_v47 = vmax.f32 %v1024_v59, 0.0 }
 0x14d   : >> { %v799_v3 = vpop.permute.xlu0 %798  ;;  %v1196_v45 = vpack.c.bf16 %v1160_v39, %v1158_v63  ;;  %v1087_v6 = vmax.f32 %v1023_v54, 0.0  ;;  %v988_v15 = vsub.f32 1.0, %v924_v19  ;;  %v989_v42 = vsub.f32 1.0, %v2278_v22  ;;  %v2585_v54 = vld [vmem:[#allocation71_spill] sm:$0xff]  ;;  %v2586_v39 = vld [vmem:[#allocation72_spill] sm:$0xff] }
 0x14e   : >> { %v890_v61 = vsub.f32 %v799_v3, %v2088_v62  ;;  %v891_v1 = vsub.f32 %v799_v3, %v2094_v32  ;;  %v727_v18 = vpop.permute.xlu2 %726  ;;  %v1026_v55 = vsub.f32 1.0, %v962_v8  ;;  %v1027_v28 = vsub.f32 1.0, %v963_v51  ;;  %v2587_v51 = vld [vmem:[#allocation64_spill] sm:$0xff] }
 0x14f   : >> { %v854_v34 = vsub.f32 %v727_v18, %v2088_v62  ;;  %v855_v41 = vsub.f32 %v727_v18, %v2094_v32  ;;  %1224 = vmatpush.bf16.msra.mxu1 %v1196_v45  ;;  %v1197_v27 = vpack.c.bf16 %v1161_v36, %v1159_v26  ;;  %v1089_v48 = vmax.f32 %v1025_v7, 0.0 }
 0x150   : >> { %v954_v21 = vand.u32 2147483647, %v890_v61  ;;  %v955_v9 = vand.u32 2147483647, %v891_v1  ;;  %v1090_v52 = vmax.f32 %v1026_v55, 0.0  ;;  %v1091_v44 = vmax.f32 %v1027_v28, 0.0  ;;  %v747_v5 = vpop.permute.xlu1 %746 }
 0x151   : >> { %v1156_v53 = vmul.f32 %v1092_v11, %v2178_v0  ;;  %v918_v17 = vand.u32 2147483647, %v854_v34  ;;  %v919_v56 = vand.u32 2147483647, %v855_v41  ;;  %1250 = vmatpush.bf16.msra.mxu3 %v1197_v27  ;;  %v864_v12 = vsub.f32 %v747_v5, %v2088_v62  ;;  %v2588_v28 = vld [vmem:[#allocation60_spill] sm:$0xff] }
 0x152   : >> { %v1018_v29 = vsub.f32 1.0, %v954_v21  ;;  %v1019_v4 = vsub.f32 1.0, %v955_v9  ;;  %v865_v25 = vsub.f32 %v747_v5, %v2094_v32  ;;  %v1157_v2 = vmul.f32 %v1093_v14, %v2184_v60 }
 0x153   : >> { %v1152_v40 = vmul.f32 %v1088_v47, %v2090_v37  ;;  %v1154_v11 = vmul.f32 %v1090_v52, %v2187_v46  ;;  %v1155_v13 = vmul.f32 %v1091_v44, %v2189_v57  ;;  %v928_v30 = vand.u32 2147483647, %v864_v12 }
 0x154   : >> { %v929_v58 = vand.u32 2147483647, %v865_v25  ;;  %v1150_v50 = vmul.f32 %v1086_v31, %v2585_v54  ;;  %v1052_v59 = vmax.f32 %v988_v15, 0.0  ;;  %v1053_v38 = vmax.f32 %v989_v42, 0.0  ;;  %v2589_v42 = vld [vmem:[#allocation58_spill] sm:$0xff] }
 0x155   : >> { %v731_v33 = vpop.permute.xlu0 %730  ;;  %v1194_v14 = vpack.c.bf16 %v1156_v53, %v1154_v11  ;;  %v1195_v37 = vpack.c.bf16 %v1157_v2, %v1155_v13  ;;  %v992_v19 = vsub.f32 1.0, %v928_v30  ;;  %v982_v24 = vsub.f32 1.0, %v918_v17  ;;  %v2590_v2 = vld [vmem:[#allocation61_spill] sm:$0xff] }
 0x156   : >> { %v856_v49 = vsub.f32 %v731_v33, %v2088_v62  ;;  %v857_v16 = vsub.f32 %v731_v33, %v2094_v32  ;;  %v795_v0 = vpop.permute.xlu2 %794  ;;  %v993_v22 = vsub.f32 1.0, %v929_v58  ;;  %v1192_v57 = vpack.c.bf16 %v1152_v40, %v1150_v50 }
 0x157   : >> { %v888_v10 = vsub.f32 %v795_v0, %v2088_v62  ;;  %v889_v60 = vsub.f32 %v795_v0, %v2094_v32  ;;  %1225 = vmatpush.bf16.msra.mxu1 %v1194_v14  ;;  %1251 = vmatpush.bf16.msra.mxu3 %v1195_v37  ;;  %v2304_v3 = vmax.f32 %v1018_v29, 0.0  ;;  %v2306_v63 = vmax.f32 %v1019_v4, 0.0 }
 0x158   : >> { %v920_v35 = vand.u32 2147483647, %v856_v49  ;;  %v921_v23 = vand.u32 2147483647, %v857_v16  ;;  %v983_v26 = vsub.f32 1.0, %v919_v56  ;;  %v1056_v7 = vmax.f32 %v992_v19, 0.0  ;;  %v735_v18 = vpop.permute.xlu1 %734 }
 0x159   : >> { %v952_v46 = vand.u32 2147483647, %v888_v10  ;;  %v2308_v1 = vand.u32 2147483647, %v889_v60  ;;  %v1151_v8 = vmul.f32 %v1087_v6, %v2586_v39  ;;  %v1153_v34 = vmul.f32 %v1089_v48, %v2587_v51  ;;  %v2591_v49 = vld [vmem:[#allocation59_spill] sm:$0xff] }
 0x15a   : >> { %v984_v61 = vsub.f32 1.0, %v920_v35  ;;  %v1057_v41 = vmax.f32 %v993_v22, 0.0  ;;  %v985_v21 = vsub.f32 1.0, %v921_v23  ;;  %v858_v9 = vsub.f32 %v735_v18, %v2088_v62  ;;  %v2592_v35 = vld [vmem:[#allocation49_spill] sm:$0xff]  ;;  %v2593_v22 = vld [vmem:[#allocation50_spill] sm:$0xff] }
 0x15b   : >> { %v859_v45 = vsub.f32 %v735_v18, %v2094_v32  ;;  %v1016_v31 = vsub.f32 1.0, %v952_v46  ;;  %1226 = vmatpush.bf16.msra.mxu1 %v1192_v57  ;;  %v1193_v47 = vpack.c.bf16 %v1153_v34, %v1151_v8  ;;  %v1118_v15 = vmul.f32 %v2273_v20, %v2588_v28  ;;  %v2594_v57 = vld [vmem:[#allocation47_spill] sm:$0xff]  ;;  %v2597_v8 = vld [vmem:[#allocation54_spill] sm:$0xff]  ;;  %v2598_v28 = vld [vmem:[#allocation53_spill] sm:$0xff] }
 0x15c   : >> { %v1120_v27 = vmul.f32 %v1056_v7, %v2589_v42  ;;  %v922_v6 = vand.u32 2147483647, %v858_v9  ;;  %v1046_v53 = vmax.f32 %v982_v24, 0.0  ;;  %v1047_v29 = vmax.f32 %v983_v26, 0.0  ;;  %v2595_v7 = vld [vmem:[#allocation48_spill] sm:$0xff]  ;;  %v2599_v42 = vld [vmem:[#allocation55_spill] sm:$0xff] }
 0x15d   : >> { %v2314_v36 = vpop.permute.xlu0 %718  ;;  %v923_v52 = vand.u32 2147483647, %v859_v45  ;;  %v1017_v4 = vsub.f32 1.0, %v2308_v1  ;;  %1252 = vmatpush.bf16.msra.mxu3 %v1193_v47  ;;  %v1048_v33 = vmax.f32 %v984_v61, 0.0  ;;  %v1049_v20 = vmax.f32 %v985_v21, 0.0 }
 0x15e   : >> { %v783_v55 = vpop.permute.xlu2 %782  ;;  %v1176_v17 = vpack.c.bf16 %v1120_v27, %v1118_v15  ;;  %v986_v56 = vsub.f32 1.0, %v922_v6  ;;  %v1119_v40 = vmul.f32 %v2275_v43, %v2590_v2  ;;  %v1121_v16 = vmul.f32 %v1057_v41, %v2591_v49 }
 0x15f   : >> { %v882_v48 = vsub.f32 %v783_v55, %v2088_v62  ;;  %v883_v44 = vsub.f32 %v783_v55, %v2094_v32  ;;  %v987_v5 = vsub.f32 1.0, %v923_v52  ;;  %v2325_v0 = vmax.f32 %v1016_v31, 0.0 }
 0x160   : >> { %1213 = vmatpush.bf16.msra.mxu0 %v1176_v17  ;;  %v1050_v11 = vmax.f32 %v986_v56, 0.0  ;;  %v850_v30 = vsub.f32 %v2314_v36, %v2088_v62  ;;  %v851_v58 = vsub.f32 %v2314_v36, %v2094_v32  ;;  %v1177_v54 = vpack.c.bf16 %v1121_v16, %v1119_v40  ;;  %v803_v50 = vpop.permute.xlu1 %802 }
 0x161   : >> { %v946_v12 = vand.u32 2147483647, %v882_v48  ;;  %v947_v25 = vand.u32 2147483647, %v883_v44  ;;  %v1051_v13 = vmax.f32 %v987_v5, 0.0  ;;  %v1116_v60 = vmul.f32 %v1052_v59, %v2592_v35  ;;  %v2596_v59 = vld [vmem:[#allocation52_spill] sm:$0xff] }
 0x162   : >> { %v892_v43 = vsub.f32 %v803_v50, %v2088_v62  ;;  %v893_v37 = vsub.f32 %v803_v50, %v2094_v32  ;;  %v1117_v23 = vmul.f32 %v1053_v38, %v2593_v22  ;;  %1239 = vmatpush.bf16.msra.mxu2 %v1177_v54  ;;  %v1114_v26 = vmul.f32 %v1050_v11, %v2594_v57  ;;  %v2600_v44 = vld [vmem:[#allocation62_spill] sm:$0xff]  ;;  %v2605_v54 = vld [vmem:[#allocation56_spill] sm:$0xff] }
 0x163   : >> { %v1010_v10 = vsub.f32 1.0, %v946_v12  ;;  %v1011_v14 = vsub.f32 1.0, %v947_v25  ;;  %v1115_v61 = vmul.f32 %v1051_v13, %v2595_v7  ;;  %v1110_v39 = vmul.f32 %v1046_v53, %v2596_v59  ;;  %v2601_v25 = vld [vmem:[#allocation63_spill] sm:$0xff]  ;;  %v2609_v57 = vld [vmem:[#allocation46_spill] sm:$0xff]  ;;  %v2612_v7 = vld [vmem:[#allocation45_spill] sm:$0xff] }
 0x164   : >> { %v956_v1 = vand.u32 2147483647, %v892_v43  ;;  %v957_v18 = vand.u32 2147483647, %v893_v37  ;;  %v1112_v51 = vmul.f32 %v1048_v33, %v2597_v8  ;;  %v1174_v21 = vpack.c.bf16 %v1116_v60, %v1114_v26  ;;  %v2611_v26 = vld [vmem:[#allocation44_spill] sm:$0xff]  ;;  %v2615_v8 = vld [vmem:[#allocation67_spill] sm:$0xff] }
 0x165   : >> { %v787_v19 = vpop.permute.xlu0 %786  ;;  %v1175_v9 = vpack.c.bf16 %v1117_v23, %v1115_v61  ;;  %v1074_v38 = vmax.f32 %v1010_v10, 0.0  ;;  %v1111_v15 = vmul.f32 %v1047_v29, %v2598_v28  ;;  %v1113_v27 = vmul.f32 %v1049_v20, %v2599_v42  ;;  %v2602_v29 = vld [vmem:[#allocation73_spill] sm:$0xff]  ;;  %v2603_v20 = vld [vmem:[#allocation74_spill] sm:$0xff] }
 0x166   : >> { %v884_v24 = vsub.f32 %v787_v19, %v2088_v62  ;;  %v885_v46 = vsub.f32 %v787_v19, %v2094_v32  ;;  %v1020_v45 = vsub.f32 1.0, %v956_v1  ;;  %v1021_v36 = vsub.f32 1.0, %v957_v18  ;;  %1214 = vmatpush.bf16.msra.mxu0 %v1174_v21  ;;  %v2606_v19 = vld [vmem:[#allocation66_spill] sm:$0xff]  ;;  %v2607_v23 = vld [vmem:[#allocation57_spill] sm:$0xff] }
 0x167   : >> { %v1172_v31 = vpack.c.bf16 %v1112_v51, %v1110_v39  ;;  %1240 = vmatpush.bf16.msra.mxu2 %v1175_v9  ;;  %v1075_v6 = vmax.f32 %v1011_v14, 0.0  ;;  %v1146_v53 = vmul.f32 %v2304_v3, %v2600_v44  ;;  %v1173_v12 = vpack.c.bf16 %v1113_v27, %v1111_v15  ;;  %v2604_v3 = vld [vmem:[#allocation65_spill] sm:$0xff] }
 0x168   : >> { %v948_v34 = vand.u32 2147483647, %v884_v24  ;;  %v949_v41 = vand.u32 2147483647, %v885_v46  ;;  %v1084_v52 = vmax.f32 %v1020_v45, 0.0  ;;  %v1085_v48 = vmax.f32 %v1021_v36, 0.0  ;;  %v791_v5 = vpop.permute.xlu1 %790 }
 0x169   : >> { %v1147_v33 = vmul.f32 %v2306_v63, %v2601_v25  ;;  %v886_v2 = vsub.f32 %v791_v5, %v2088_v62  ;;  %v887_v40 = vsub.f32 %v791_v5, %v2094_v32  ;;  %v1081_v11 = vmax.f32 %v1017_v4, 0.0  ;;  %v2608_v46 = vld [vmem:[#allocation43_spill] sm:$0xff]  ;;  %v2619_v45 = vld [vmem:[#allocation69_spill] sm:$0xff] }
 0x16a   : >> { %v1012_v47 = vsub.f32 1.0, %v948_v34  ;;  %v1013_v55 = vsub.f32 1.0, %v949_v41  ;;  %v1148_v49 = vmul.f32 %v1084_v52, %v2602_v29  ;;  %v1149_v16 = vmul.f32 %v1085_v48, %v2603_v20  ;;  %1215 = vmatpush.bf16.msra.mxu0 %v1172_v31  ;;  %v2617_v41 = vld [vmem:[#allocation68_spill] sm:$0xff] }
 0x16b   : >> { %v914_v13 = vand.u32 2147483647, %v850_v30  ;;  %1241 = vmatpush.bf16.msra.mxu2 %v1173_v12  ;;  %v1138_v10 = vmul.f32 %v1074_v38, %v2604_v3  ;;  %v950_v35 = vand.u32 2147483647, %v886_v2  ;;  %v951_v60 = vand.u32 2147483647, %v887_v40 }
 0x16c   : >> { %v1076_v17 = vmax.f32 %v1012_v47, 0.0  ;;  %v1077_v56 = vmax.f32 %v1013_v55, 0.0  ;;  %v1190_v14 = vpack.c.bf16 %v1148_v49, %v1146_v53  ;;  %v1191_v63 = vpack.c.bf16 %v1149_v16, %v1147_v33  ;;  %v2621_v47 = vld [vmem:[#allocation70_spill] sm:$0xff]  ;;  %v2623_v12 = vld [vmem:[#allocation51_spill] sm:$0xff] }
 0x16d   : >> { %v915_v43 = vand.u32 2147483647, %v851_v58  ;;  %v1139_v22 = vmul.f32 %v1075_v6, %v2606_v19  ;;  %v2610_v4 = vsub.f32 %v2608_v46, %v2609_v57  ;;  %v2613_v61 = vsub.f32 %v2611_v26, %v2612_v7  ;;  %v2624_v3 = vld [vmem:[#allocation42_spill] sm:$0xff] }
 0x16e   : >> { %v1140_v50 = vmul.f32 %v1076_v17, %v2605_v54  ;;  %v1141_v24 = vmul.f32 %v1077_v56, %v2607_v23  ;;  %v1014_v18 = vsub.f32 1.0, %v950_v35  ;;  %v1015_v59 = vsub.f32 1.0, %v951_v60  ;;  %1227 = vmatpush.bf16.msra.mxu1 %v1190_v14  ;;  %1253 = vmatpush.bf16.msra.mxu3 %v1191_v63  ;;  %v1263_v7 = vld [vmem:[%s1262_s5] sm:$0xff] }
 0x16f   : >> { %v526_v30 = vand.u32 2147483647, %v2610_v4  ;;  %v527_v1 = vand.u32 2147483647, %v2613_v61  ;;  %v2614_v58 = vsub.f32 %v2611_v26, %v2609_v57  ;;  %v2616_v51 = vsub.f32 1.0, %v2615_v8 }
 0x170   : >> { %v1186_v37 = vpack.c.bf16 %v1140_v50, %v1138_v10  ;;  %v2618_v21 = vsub.f32 1.0, %v2617_v41  ;;  %v1187_v38 = vpack.c.bf16 %v1141_v24, %v1139_v22  ;;  %v2620_v36 = vsub.f32 1.0, %v2619_v45  ;;  %v723_v52 = vpop.permute.xlu1 %722 }
 0x171   : >> { %v528_v39 = vand.u32 2147483647, %v2614_v58  ;;  %v691_v34 = vmax.f32 %v2616_v51, 0.0  ;;  %v2622_v55 = vsub.f32 1.0, %v2621_v47  ;;  %v1078_v15 = vmax.f32 %v1014_v18, 0.0  ;;  %v1264_v58 = vld [vmem:[%s1262_s5 + $0x8] sm:$0xff] }
 0x172   : >> { %v692_v9 = vmax.f32 %v2618_v21, 0.0  ;;  %v689_v31 = vmax.f32 %v2620_v36, 0.0  ;;  %v1079_v42 = vmax.f32 %v1015_v59, 0.0  ;;  %v978_v27 = vsub.f32 1.0, %v914_v13 }
 0x173   : >> { %v690_v28 = vmax.f32 %v2622_v55, 0.0  ;;  %v979_v6 = vsub.f32 1.0, %v915_v43  ;;  %v1144_v48 = vmul.f32 %v2325_v0, %v691_v34  ;;  %v852_v53 = vsub.f32 %v723_v52, %v2088_v62 }
 0x174   : >> { %v1145_v44 = vmul.f32 %v1081_v11, %v692_v9  ;;  %v853_v17 = vsub.f32 %v723_v52, %v2094_v32  ;;  %v1142_v56 = vmul.f32 %v1078_v15, %v689_v31  ;;  %v589_v25 = vsub.f32 1.0, %v2623_v12 }
 0x175   : >> { %v1143_v5 = vmul.f32 %v1079_v42, %v690_v28  ;;  %v590_v33 = vsub.f32 1.0, %v526_v30  ;;  %v591_v2 = vsub.f32 1.0, %v527_v1  ;;  %v592_v40 = vsub.f32 1.0, %v528_v39 }
 0x176   : >> { %v916_v29 = vand.u32 2147483647, %v852_v53  ;;  %v917_v49 = vand.u32 2147483647, %v853_v17  ;;  %v1188_v20 = vpack.c.bf16 %v1144_v48, %v1142_v56  ;;  %v1042_v13 = vmax.f32 %v978_v27, 0.0 }
 0x177   : >> { %v1189_v16 = vpack.c.bf16 %v1145_v44, %v1143_v5  ;;  %v1204_v10 = vunpack.c.h.b16 %v2624_v3  ;;  %v1043_v0 = vmax.f32 %v979_v6, 0.0  ;;  %v653_v32 = vmax.f32 %v589_v25, 0.0 }
 0x178   : >> { %v980_v11 = vsub.f32 1.0, %v916_v29  ;;  %v981_v54 = vsub.f32 1.0, %v917_v49  ;;  %1228 = vmatpush.bf16.msra.mxu1 %v1188_v20  ;;  %v654_v62 = vmax.f32 %v590_v33, 0.0  ;;  %v655_v50 = vmax.f32 %v591_v2, 0.0 }
 0x179   : >> { %1254 = vmatpush.bf16.msra.mxu3 %v1189_v16  ;;  %v656_v35 = vmax.f32 %v592_v40, 0.0  ;;  %v1206_v63 = vpack.c.b16 %v1204_v10, %v1204_v10  ;;  %v1106_v43 = vmul.f32 %v1042_v13, %v653_v32  ;;  %v1203_v19 = vunpack.c.l.b16 %v2624_v3 }
 0x17a   : >> { %v1044_v60 = vmax.f32 %v980_v11, 0.0  ;;  %v1045_v14 = vmax.f32 %v981_v54, 0.0  ;;  %v1107_v23 = vmul.f32 %v1043_v0, %v654_v62 }
 0x17b   : >> { %v1205_v4 = vpack.c.b16 %v1203_v19, %v1203_v19 }
 0x17c   : >> { %1229 = vmatpush.bf16.msra.mxu1 %v1186_v37  ;;  %v1108_v22 = vmul.f32 %v1044_v60, %v655_v50  ;;  %v1109_v24 = vmul.f32 %v1045_v14, %v656_v35 }
 0x17d   : >> { %1255 = vmatpush.bf16.msra.mxu3 %v1187_v38 }
 0x17e   : >> { %v1170_v46 = vpack.c.bf16 %v1108_v22, %v1106_v43  ;;  %v1171_v57 = vpack.c.bf16 %v1109_v24, %v1107_v23 }
 0x17f   : >> { %1230 = vmatmul.bf16.vlgmr.msra.gmra.mxu1 %v1206_v63 }
 0x180   : >> { %1256 = vmatmul.bf16.vlgmr.msra.gmra.mxu3 %v1206_v63  ;;  %1216 = vmatpush.bf16.msra.mxu0 %v1170_v46 }
 0x181   : >> { %1242 = vmatpush.bf16.msra.mxu2 %v1171_v57 }
 0x183   : >> { %1217 = vmatmul.bf16.vlgmr.msra.gmra.mxu0 %v1205_v4 }
 0x184   : >> { %1243 = vmatmul.bf16.vlgmr.msra.gmra.mxu2 %v1205_v4 }
 0x1fc   : >> { %v1231_v30 = vpop.f32.mrf.mxu1 }
 0x200   : >> { %v1218_v26 = vpop.f32.mrf.mxu0 }
 0x201   : >> { %v1232_v61 = vadd.f32 %v1231_v30, %v1218_v26 }
 0x203   : >> { %v1257_v37 = vpop.f32.mrf.mxu3  ;;  %v1265_v1 = vadd.f32 %v1263_v7, %v1232_v61 }
 0x204   : >> { %v1233_v18 = vpop.f32.mrf.mxu1 }
 0x205   : >> { %1267 = vst [vmem:[%s1262_s5] sm:$0xff] %v1265_v1 }
 0x207   : >> { %v1244_v59 = vpop.f32.mrf.mxu2 }
 0x208   : >> { %v1258_v39 = vadd.f32 %v1257_v37, %v1244_v59  ;;  %v1220_v8 = vpop.f32.mrf.mxu0 }
 0x20a   : >> { %v1266_v51 = vadd.f32 %v1264_v58, %v1258_v39 }
 0x20b   : >> { %v1259_v34 = vpop.f32.mrf.mxu3  ;;  %286 = sbr.rel (!%p284_p2) target bundleno = 79 (0x4f), region = 91 }
 0x20c   : >> { %1268 = vst [vmem:[%s1262_s5 + $0x8] sm:$0xff] %v1266_v51 }
 0x20f   : >> { %v1246_v41 = vpop.f32.mrf.mxu2 }
 0x210   : > { %1272 = sbr.rel (%p1427_p4) target bundleno = 539 (0x21b), region = 47 }
 0x215   : > { %v1273_v21 = vld [vmem:[#allocation2] sm:$0xff]  ;;  %v1274_v9 = vld [vmem:[#allocation2 + $0x8] sm:$0xff]  ;;  %v1275_v38 = vld [vmem:[#allocation2 + $0x10] sm:$0xff] }
 0x216   : > { %v1279_v45 = vpack.c.bf16 %v1274_v9, %v1273_v21  ;;  %v1276_v36 = vld [vmem:[#allocation2 + $0x18] sm:$0xff]  ;;  %v1277_v31 = vld [vmem:[#allocation2 + $0x20] sm:$0xff]  ;;  %v1278_v47 = vld [vmem:[#allocation2 + $0x28] sm:$0xff] }
 0x217   : > { %v1280_v55 = vpack.c.bf16 %v1276_v36, %v1275_v38  ;;  %v1281_v28 = vpack.c.bf16 %v1278_v47, %v1277_v31 }
 0x218   : > { %1282 = vst [vmem:[%s1742_s30] sm:$0xff] %v1279_v45 }
 0x219   : > { %1283 = vst [vmem:[%s1742_s30 + $0x8] sm:$0xff] %v1280_v55 }
 0x21a   : > { %1284 = vst [vmem:[%s1742_s30 + $0x10] sm:$0xff] %v1281_v28 }
 0x21b PF: > { %s1433_s15 = smul.u32 24, %s1610_s16  ;;  %s1299_s6 = sshll.u32 %s1742_s30, 4  ;;  %s1300_s6 = int_to_ptr.vmem [resolvable:$true] %s1299_s6 }
 0x21c   : > { %s2625_s11 = sand.u32 1, %s1598_s13   ;;  %s1544_s16 = scalar_lea.hbm %s2434_s3, 48 }
 0x21d   : > { %s1297_s9 = scalar_lea.hbm %s2434_s3, %s1433_s15  ;;  %s1286_s20 = scalar_lea.sflag [#allocation4], %s2625_s11 }
 0x21e   : > { %s1301_s10 = sshll.u32 %s1297_s9, 4  ;;  %s1302_s10 = int_to_ptr.hbm [resolvable:$true] %s1301_s10 }
 0x21f   : > { %s1538_s21 = sshra.s32 %s1302_s10, 4  ;;  %s1539_s21 = int_to_ptr.hbm [resolvable:$true] %s1538_s21 }
 0x220   : > { %s1540_s26 = scalar_lea.hbm %s1539_s21, 24  ;;  %p1545_p8 = scmp.lt.s32.totalorder %s1539_s21, %s2434_s3 }
 0x221   : > { %p1541_p5 = scmp.ne.s32.totalorder %s1539_s21, %s1540_s26  ;;  %p1546_p10 = scmp.lt.s32.totalorder %s1544_s16, %s1540_s26 }
 0x223   : > { %p1542_p6 = pnand %p1541_p5, %p1700_p3  ;;  %p1547_p11 = por %p1546_p10, %p1545_p8 }
 0x225   : > { %p1543_p7 = pneg %p1542_p6 }
 0x227   : > { %p1548_p12 = pnand %p1547_p11, %p1543_p7 }
 0x229   : > { %1551 = shalt.err (!%p1548_p12)
}
 0x22a   : > { %1434 = dma.vmem_to_hbm [thread:$0]  (%p1700_p3), %s1300_s6, 384, %s1302_s10, %s1286_s20  }
 0x22b PF: > { %p1440_p13 = scmp.ge.s32.totalorder %s1622_s19, 2  ;;  %s1313_s22 = sand.u32 1, %s1594_s12  }
 0x22c   : > { %s1314_s23 = scalar_lea.sflag [#allocation4], %s1313_s22 }
 0x22d   : > { %p1437_p0 = pnand %p1440_p13, %p1710_p9 }
 0x22f   : > { %p1438_p1 = pneg %p1437_p0 }
 0x231   : > { %1589 = dma.done.wait (%p1438_p1), %s1314_s23, 384  }
 0x232   : > { %1591 = vsyncadd (%p1438_p1), %s1314_s23, 4294966912  ;;  %s16_s19 = sadd.s32 1, %s1622_s19   ;;  %s2626_s15 = sld [smem:[#allocation6_spill]] }
 0x233   : > { %p13_p2 = scmp.ge.s32.totalorder %s16_s19, 10   ;;  %s2627_s16 = sld [smem:[#allocation7_spill]] }
 0x234   : > { %s2628_s17 = sld [smem:[#allocation8_spill]]  ;;  %s2630_s12 = smov %s1598_s13 }
 0x235   : > { %s2629_s18 = sld [smem:[#allocation9_spill]]  ;;  %s2631_s13 = smov %s1602_s14 }
 0x236   : > { %s2632_s14 = smov %s1718_s28  ;;  %15 = sbr.rel (!%p13_p2) target bundleno = 5 (0x5), region = 102 }
 0x23b   :  { %1320 = vsyncpa [#allocation4], 1 }
 0x23c   :  { %1322 = vsyncpa [#allocation4 + $0x1], 1 }

</bundles_post_ra>
